<compile_context>
chip_gen: v5e
topology: v5e:2x2
jax: 0.10.0
libtpu: 0.0.40
codegen_flags: <defaults>
</compile_context>

<pallas_src>
import functools

import jax
import jax.numpy as jnp
from jax import lax
from jax.experimental import pallas as pl
from jax.experimental.pallas import tpu as pltpu


# ----------------------------- config (small) ------------------------------
VOCAB = 128
MAX_POS = 64
HIDDEN = 128
NUM_HEADS = 4
HEAD_DIM = HIDDEN // NUM_HEADS
INTERMEDIATE = 256
NUM_LAYERS = 2
PROJ = 128          # projection head size (real CXR-BERT also uses 128)
LN_EPS = 1e-12
NEG_INF = -1e9


def _gelu(x):
    # TODO(synk): HF BERT uses erf-GELU; tanh approximation kept for a clean
    #             EUP-friendly Mosaic lowering (~1e-3 relative deviation).
    return 0.5 * x * (1.0 + jnp.tanh(0.7978845608028654 * (x + 0.044715 * x * x * x)))


def _layer_norm(x, g, b, eps=LN_EPS):
    # f32 statistics, rsqrt on the EUP slot.
    mean = jnp.mean(x, axis=-1, keepdims=True)
    var = jnp.mean(jnp.square(x - mean), axis=-1, keepdims=True)
    return (x - mean) * lax.rsqrt(var + eps) * g + b


def _dot(a, b):
    # a cast to bf16, b is already bf16 (stored weights) or bf16 activation.
    return jnp.dot(a.astype(jnp.bfloat16), b, preferred_element_type=jnp.float32)


def _dot_bt(a, b):
    # a @ b.T expressed via dimension numbers (no materialized transpose).
    return lax.dot_general(a.astype(jnp.bfloat16), b.astype(jnp.bfloat16),
                           (((1,), (1,)), ((), ())),
                           preferred_element_type=jnp.float32)


# ---------------------- single fused forward kernel ------------------------
def _fused_forward_kernel(
    # activations / precomputed constants
    h0_ref, smask_ref, hmask_ref, sel_ref, emb_g_ref, emb_b_ref,
    # per-layer weights, stacked on a leading layer axis (indexed statically)
    wqkv_ref, bqkv_ref, wo_ref, bo_ref, ln1_g_ref, ln1_b_ref,
    wi_ref, bi_ref, wo2_ref, bo2_ref, ln2_g_ref, ln2_b_ref,
    # projection head
    wp1_ref, bp1_ref, wp2_ref, bp2_ref,
    # output
    out_ref,
    *, batch, seq, hidden, n_heads, n_layers, scale):

    bs = batch * seq

    # --- BERT embedding LayerNorm ---
    h = _layer_norm(h0_ref[...], emb_g_ref[...], emb_b_ref[...])        # (BS,H) f32

    smask = smask_ref[...]     # (NH*BS, BS) additive score mask (pad + x-seq), f32
    hmask = hmask_ref[...]     # (NH*BS, H)  0/1 head-lane selector mask, f32

    for l in range(n_layers):                        # static unroll (L=2)
        # --- fused QKV projection: one (H, 3H) MXU pass ---
        qkv = _dot(h, wqkv_ref[l]) + bqkv_ref[l]                          # (BS,3H) f32
        q = qkv[:, 0 * hidden:1 * hidden]                                 # (BS,H)  f32
        k = qkv[:, 1 * hidden:2 * hidden].astype(jnp.bfloat16)            # (BS,H)  bf16
        v = qkv[:, 2 * hidden:3 * hidden].astype(jnp.bfloat16)            # (BS,H)  bf16

        # --- attention: all heads & all sequences in 2 MXU passes ---
        # Row (head*BS + r) of xq holds query r with only head `head`'s lanes
        # kept, so a full-H contraction against k gives per-head scores.
        xq = jnp.concatenate([q] * n_heads, axis=0) * hmask               # (NH*BS,H)
        s = _dot_bt(xq, k) * scale + smask                                # (NH*BS,BS)
        s = s - jnp.max(s, axis=-1, keepdims=True)
        p = jnp.exp(s)
        p = p * pl.reciprocal(jnp.sum(p, axis=-1, keepdims=True), approx=True)

        c = _dot(p, v) * hmask                                            # (NH*BS,H)
        ctx = c[0:bs]
        for hh in range(1, n_heads):                                      # merge heads
            ctx = ctx + c[hh * bs:(hh + 1) * bs]                          # (BS,H) f32

        # --- attention output projection + residual + LayerNorm ---
        attn = _dot(ctx, wo_ref[l]) + bo_ref[l]
        h = _layer_norm(attn + h, ln1_g_ref[l], ln1_b_ref[l])

        # --- feed-forward + residual + LayerNorm ---
        ff = _gelu(_dot(h, wi_ref[l]) + bi_ref[l])
        ff2 = _dot(ff, wo2_ref[l]) + bo2_ref[l]
        h = _layer_norm(ff2 + h, ln2_g_ref[l], ln2_b_ref[l])

    # --- CLS rows via one-hot selector matmul -> projection head -> L2 norm ---
    cls = jnp.dot(sel_ref[...], h, preferred_element_type=jnp.float32)    # (B,H) f32
    p1 = _gelu(_dot(cls, wp1_ref[...]) + bp1_ref[...])
    p2 = _dot(p1, wp2_ref[...]) + bp2_ref[...]
    nrm2 = jnp.sum(p2 * p2, axis=-1, keepdims=True)
    out_ref[...] = (p2 * lax.rsqrt(jnp.maximum(nrm2, 1e-24))).astype(out_ref.dtype)


# ------------------------------ parameter init -----------------------------
def init_params(key):
    def nrm(k, shape, scale=0.02):
        return (scale * jax.random.normal(k, shape)).astype(jnp.float32)

    keys = iter(jax.random.split(key, 32))
    L, H, I, P = NUM_LAYERS, HIDDEN, INTERMEDIATE, PROJ
    # Matmul weights stored in bf16 (MXU-native); LayerNorm params and biases
    # stay f32 (added to f32 accumulations).
    params = {
        "word_emb": nrm(next(keys), (VOCAB, H)),
        "pos_emb": nrm(next(keys), (MAX_POS, H)),
        "tok_emb": nrm(next(keys), (2, H)),
        "emb_ln_g": jnp.ones((1, H), jnp.float32),
        "emb_ln_b": jnp.zeros((1, H), jnp.float32),
        "wqkv": nrm(next(keys), (L, H, 3 * H)).astype(jnp.bfloat16),   # fused Q|K|V
        "bqkv": jnp.zeros((L, 1, 3 * H), jnp.float32),
        "wo":   nrm(next(keys), (L, H, H)).astype(jnp.bfloat16),
        "bo":   jnp.zeros((L, 1, H), jnp.float32),
        "ln1_g": jnp.ones((L, 1, H), jnp.float32),
        "ln1_b": jnp.zeros((L, 1, H), jnp.float32),
        "wi":   nrm(next(keys), (L, H, I)).astype(jnp.bfloat16),
        "bi":   jnp.zeros((L, 1, I), jnp.float32),
        "wo2":  nrm(next(keys), (L, I, H)).astype(jnp.bfloat16),
        "bo2":  jnp.zeros((L, 1, H), jnp.float32),
        "ln2_g": jnp.ones((L, 1, H), jnp.float32),
        "ln2_b": jnp.zeros((L, 1, H), jnp.float32),
        "wp1": nrm(next(keys), (H, P)).astype(jnp.bfloat16),
        "bp1": jnp.zeros((1, P), jnp.float32),
        "wp2": nrm(next(keys), (P, P)).astype(jnp.bfloat16),
        "bp2": jnp.zeros((1, P), jnp.float32),
    }
    return params


# -------------------------------- forward ----------------------------------
def transformer_embeddings_forward(params, input_ids, attention_mask):
    B, S = input_ids.shape
    H, P, L = HIDDEN, PROJ, NUM_LAYERS
    NH, DH = NUM_HEADS, HEAD_DIM
    BS = B * S

    # Embedding gathers are glue (XLA); everything downstream is one Pallas call.
    # Token-type id 0 for all positions (single-segment text path of CXR-BERT).
    h0 = (params["word_emb"][input_ids]
          + params["pos_emb"][:S][None, :, :]
          + params["tok_emb"][0][None, None, :]).reshape(BS, H).astype(jnp.float32)

    # Additive score mask, precomputed ONCE at its final (NH*BS, BS) shape:
    # a key column is valid iff it belongs to the same sequence as the query
    # row and is not padding (standard BERT key-only masking).
    tok = jnp.arange(BS, dtype=jnp.int32)
    same_seq = (tok[:, None] // S) == (tok[None, :] // S)
    key_ok = attention_mask.reshape(BS).astype(jnp.bool_)
    base = jnp.where(same_seq & key_ok[None, :], 0.0, NEG_INF).astype(jnp.float32)
    score_mask = jnp.concatenate([base] * NH, axis=0)                    # (NH*BS, BS)

    # 0/1 head-lane selector: row (h*BS + r) keeps only head h's lanes.
    head_of_row = jnp.arange(NH * BS, dtype=jnp.int32) // BS
    head_of_lane = jnp.arange(H, dtype=jnp.int32) // DH
    head_mask = (head_of_row[:, None] == head_of_lane[None, :]).astype(jnp.float32)

    # CLS-row selector (one-hot rows at positions b*S).
    sel = jax.nn.one_hot(jnp.arange(B) * S, BS, dtype=jnp.float32)       # (B, BS)

    kernel = functools.partial(
        _fused_forward_kernel,
        batch=B, seq=S, hidden=H, n_heads=NH, n_layers=L,
        scale=1.0 / (DH ** 0.5))

    # No grid: whole arrays land in VMEM (well under budget at these shapes),
    # kernel runs once with both layers unrolled inside.
    return pl.pallas_call(
        kernel,
        out_shape=jax.ShapeDtypeStruct((B, P), jnp.float32),
        compiler_params=pltpu.CompilerParams(vmem_limit_bytes=32 * 1024 * 1024),
    )(h0, score_mask, head_mask, sel,
      params["emb_ln_g"], params["emb_ln_b"],
      params["wqkv"], params["bqkv"], params["wo"], params["bo"],
      params["ln1_g"], params["ln1_b"], params["wi"], params["bi"],
      params["wo2"], params["bo2"], params["ln2_g"], params["ln2_b"],
      params["wp1"], params["bp1"], params["wp2"], params["bp2"])


# TODO(synk): pretrained CXR-BERT weights / tokenizer are not loadable here;
#             synthetic deterministic weights are used instead (same op graph).

if __name__ == "__main__":
    key = jax.random.PRNGKey(0)
    pkey, ikey = jax.random.split(key)
    params = init_params(pkey)

    B, S = 2, 8
    input_ids = jax.random.randint(ikey, (B, S), 0, VOCAB, dtype=jnp.int32)
    attention_mask = jnp.array([[1, 1, 1, 1, 1, 1, 0, 0],
                                [1, 1, 1, 1, 0, 0, 0, 0]], dtype=jnp.int32)

    out = jax.jit(transformer_embeddings_forward)(params, input_ids, attention_mask)
    out = jax.block_until_ready(out)

    assert out.shape == (B, PROJ), out.shape
    assert bool(jnp.all(jnp.isfinite(out)))
    # rows are L2-normalized
    assert bool(jnp.allclose(jnp.linalg.norm(out, axis=-1), 1.0, atol=1e-4))
    print("KERNEL_OK")
</pallas_src>

<mosaic_0001>
module attributes {stable_mosaic.version = 11 : i64} {
  func.func @_fused_forward_kernel(%arg0: memref<16x128xf32, #tpu.memory_space<vmem>>, %arg1: memref<64x16xf32, #tpu.memory_space<vmem>>, %arg2: memref<64x128xf32, #tpu.memory_space<vmem>>, %arg3: memref<2x16xf32, #tpu.memory_space<vmem>>, %arg4: memref<1x128xf32, #tpu.memory_space<vmem>>, %arg5: memref<1x128xf32, #tpu.memory_space<vmem>>, %arg6: memref<2x128x384xbf16, #tpu.memory_space<vmem>>, %arg7: memref<2x1x384xf32, #tpu.memory_space<vmem>>, %arg8: memref<2x128x128xbf16, #tpu.memory_space<vmem>>, %arg9: memref<2x1x128xf32, #tpu.memory_space<vmem>>, %arg10: memref<2x1x128xf32, #tpu.memory_space<vmem>>, %arg11: memref<2x1x128xf32, #tpu.memory_space<vmem>>, %arg12: memref<2x128x256xbf16, #tpu.memory_space<vmem>>, %arg13: memref<2x1x256xf32, #tpu.memory_space<vmem>>, %arg14: memref<2x256x128xbf16, #tpu.memory_space<vmem>>, %arg15: memref<2x1x128xf32, #tpu.memory_space<vmem>>, %arg16: memref<2x1x128xf32, #tpu.memory_space<vmem>>, %arg17: memref<2x1x128xf32, #tpu.memory_space<vmem>>, %arg18: memref<128x128xbf16, #tpu.memory_space<vmem>>, %arg19: memref<1x128xf32, #tpu.memory_space<vmem>>, %arg20: memref<128x128xbf16, #tpu.memory_space<vmem>>, %arg21: memref<1x128xf32, #tpu.memory_space<vmem>>, %arg22: memref<2x128xf32, #tpu.memory_space<vmem>>) attributes {dimension_semantics = [], scalar_prefetch = 0 : i64, scratch_operands = 0 : i64, tpu.core_type = #tpu.core_type<tc>} {
    %c0 = arith.constant 0 : index
    %c0_0 = arith.constant 0 : index
    %0 = vector.load %arg0[%c0, %c0_0] : memref<16x128xf32, #tpu.memory_space<vmem>>, vector<16x128xf32>
    %c0_1 = arith.constant 0 : index
    %c0_2 = arith.constant 0 : index
    %1 = vector.load %arg4[%c0_1, %c0_2] : memref<1x128xf32, #tpu.memory_space<vmem>>, vector<1x128xf32>
    %c0_3 = arith.constant 0 : index
    %c0_4 = arith.constant 0 : index
    %2 = vector.load %arg5[%c0_3, %c0_4] : memref<1x128xf32, #tpu.memory_space<vmem>>, vector<1x128xf32>
    %cst = arith.constant dense<0.000000e+00> : vector<16xf32>
    %3 = vector.multi_reduction <add>, %0, %cst [1] : vector<16x128xf32> to vector<16xf32>
    %4 = vector.shape_cast %3 : vector<16xf32> to vector<16x1xf32>
    %cst_5 = arith.constant 1.280000e+02 : f32
    %5 = vector.broadcast %cst_5 : f32 to vector<16x1xf32>
    %6 = arith.divf %4, %5 : vector<16x1xf32>
    %7 = vector.broadcast %6 : vector<16x1xf32> to vector<16x128xf32>
    %8 = arith.subf %0, %7 : vector<16x128xf32>
    %9 = arith.mulf %8, %8 : vector<16x128xf32>
    %cst_6 = arith.constant dense<0.000000e+00> : vector<16xf32>
    %10 = vector.multi_reduction <add>, %9, %cst_6 [1] : vector<16x128xf32> to vector<16xf32>
    %11 = vector.shape_cast %10 : vector<16xf32> to vector<16x1xf32>
    %cst_7 = arith.constant 1.280000e+02 : f32
    %12 = vector.broadcast %cst_7 : f32 to vector<16x1xf32>
    %13 = arith.divf %11, %12 : vector<16x1xf32>
    %14 = vector.broadcast %6 : vector<16x1xf32> to vector<16x128xf32>
    %15 = arith.subf %0, %14 : vector<16x128xf32>
    %cst_8 = arith.constant 9.99999996E-13 : f32
    %16 = vector.broadcast %cst_8 : f32 to vector<16x1xf32>
    %17 = arith.addf %13, %16 : vector<16x1xf32>
    %18 = math.rsqrt %17 : vector<16x1xf32>
    %19 = vector.broadcast %18 : vector<16x1xf32> to vector<16x128xf32>
    %20 = arith.mulf %15, %19 : vector<16x128xf32>
    %21 = vector.broadcast %1 : vector<1x128xf32> to vector<16x128xf32>
    %22 = arith.mulf %20, %21 : vector<16x128xf32>
    %23 = vector.broadcast %2 : vector<1x128xf32> to vector<16x128xf32>
    %24 = arith.addf %22, %23 : vector<16x128xf32>
    %c0_9 = arith.constant 0 : index
    %c0_10 = arith.constant 0 : index
    %25 = vector.load %arg1[%c0_9, %c0_10] : memref<64x16xf32, #tpu.memory_space<vmem>>, vector<64x16xf32>
    %c0_11 = arith.constant 0 : index
    %c0_12 = arith.constant 0 : index
    %26 = vector.load %arg2[%c0_11, %c0_12] : memref<64x128xf32, #tpu.memory_space<vmem>>, vector<64x128xf32>
    %c0_13 = arith.constant 0 : index
    %c0_14 = arith.constant 0 : index
    %c0_15 = arith.constant 0 : index
    %27 = vector.load %arg6[%c0_13, %c0_14, %c0_15] : memref<2x128x384xbf16, #tpu.memory_space<vmem>>, vector<1x128x384xbf16>
    %28 = vector.shape_cast %27 : vector<1x128x384xbf16> to vector<128x384xbf16>
    %29 = arith.truncf %24 : vector<16x128xf32> to vector<16x128xbf16>
    %cst_16 = arith.constant dense<0.000000e+00> : vector<16x384xf32>
    %30 = tpu.matmul %29, %28, %cst_16 {dimension_numbers = #tpu.dot_dimension_numbers<[1], [0], [0], [1], [0, 0, 1, 1], [], []>} : vector<16x128xbf16>, vector<128x384xbf16>, vector<16x384xf32> -> vector<16x384xf32>
    %c0_17 = arith.constant 0 : index
    %c0_18 = arith.constant 0 : index
    %c0_19 = arith.constant 0 : index
    %31 = vector.load %arg7[%c0_17, %c0_18, %c0_19] : memref<2x1x384xf32, #tpu.memory_space<vmem>>, vector<1x1x384xf32>
    %32 = vector.shape_cast %31 : vector<1x1x384xf32> to vector<1x384xf32>
    %33 = vector.broadcast %32 : vector<1x384xf32> to vector<16x384xf32>
    %34 = arith.addf %30, %33 : vector<16x384xf32>
    %35 = vector.extract_strided_slice %34 {offsets = [0, 0], sizes = [16, 128], strides = [1, 1]} : vector<16x384xf32> to vector<16x128xf32>
    %36 = vector.extract_strided_slice %34 {offsets = [0, 128], sizes = [16, 128], strides = [1, 1]} : vector<16x384xf32> to vector<16x128xf32>
    %37 = arith.truncf %36 : vector<16x128xf32> to vector<16x128xbf16>
    %38 = vector.extract_strided_slice %34 {offsets = [0, 256], sizes = [16, 128], strides = [1, 1]} : vector<16x384xf32> to vector<16x128xf32>
    %39 = arith.truncf %38 : vector<16x128xf32> to vector<16x128xbf16>
    %40 = tpu.concatenate %35, %35, %35, %35 in 0 : vector<16x128xf32>, vector<16x128xf32>, vector<16x128xf32>, vector<16x128xf32> -> vector<64x128xf32>
    %41 = arith.mulf %40, %26 : vector<64x128xf32>
    %42 = arith.truncf %41 : vector<64x128xf32> to vector<64x128xbf16>
    %cst_20 = arith.constant dense<0.000000e+00> : vector<64x16xf32>
    %43 = tpu.matmul %42, %37, %cst_20 {dimension_numbers = #tpu.dot_dimension_numbers<[1], [1], [0], [0], [0, 0, 1, 0], [], []>} : vector<64x128xbf16>, vector<16x128xbf16>, vector<64x16xf32> -> vector<64x16xf32>
    %cst_21 = arith.constant 0.176776692 : f32
    %44 = vector.broadcast %cst_21 : f32 to vector<64x16xf32>
    %45 = arith.mulf %43, %44 : vector<64x16xf32>
    %46 = arith.addf %45, %25 : vector<64x16xf32>
    %cst_22 = arith.constant dense<0xFF800000> : vector<64xf32>
    %47 = vector.multi_reduction <maximumf>, %46, %cst_22 [1] : vector<64x16xf32> to vector<64xf32>
    %48 = vector.shape_cast %47 : vector<64xf32> to vector<64x1xf32>
    %49 = vector.broadcast %48 : vector<64x1xf32> to vector<64x16xf32>
    %50 = arith.subf %46, %49 : vector<64x16xf32>
    %51 = math.exp %50 : vector<64x16xf32>
    %cst_23 = arith.constant dense<0.000000e+00> : vector<64xf32>
    %52 = vector.multi_reduction <add>, %51, %cst_23 [1] : vector<64x16xf32> to vector<64xf32>
    %53 = vector.shape_cast %52 : vector<64xf32> to vector<64x1xf32>
    %54 = tpu.reciprocal %53 {approx = true} : vector<64x1xf32> -> vector<64x1xf32>
    %55 = vector.broadcast %54 : vector<64x1xf32> to vector<64x16xf32>
    %56 = arith.mulf %51, %55 : vector<64x16xf32>
    %57 = arith.truncf %56 : vector<64x16xf32> to vector<64x16xbf16>
    %cst_24 = arith.constant dense<0.000000e+00> : vector<64x128xf32>
    %58 = tpu.matmul %57, %39, %cst_24 {dimension_numbers = #tpu.dot_dimension_numbers<[1], [0], [0], [1], [0, 0, 1, 1], [], []>} : vector<64x16xbf16>, vector<16x128xbf16>, vector<64x128xf32> -> vector<64x128xf32>
    %59 = arith.mulf %58, %26 : vector<64x128xf32>
    %60 = vector.extract_strided_slice %59 {offsets = [0, 0], sizes = [16, 128], strides = [1, 1]} : vector<64x128xf32> to vector<16x128xf32>
    %61 = vector.extract_strided_slice %59 {offsets = [16, 0], sizes = [16, 128], strides = [1, 1]} : vector<64x128xf32> to vector<16x128xf32>
    %62 = arith.addf %60, %61 : vector<16x128xf32>
    %63 = vector.extract_strided_slice %59 {offsets = [32, 0], sizes = [16, 128], strides = [1, 1]} : vector<64x128xf32> to vector<16x128xf32>
    %64 = arith.addf %62, %63 : vector<16x128xf32>
    %65 = vector.extract_strided_slice %59 {offsets = [48, 0], sizes = [16, 128], strides = [1, 1]} : vector<64x128xf32> to vector<16x128xf32>
    %66 = arith.addf %64, %65 : vector<16x128xf32>
    %c0_25 = arith.constant 0 : index
    %c0_26 = arith.constant 0 : index
    %c0_27 = arith.constant 0 : index
    %67 = vector.load %arg8[%c0_25, %c0_26, %c0_27] : memref<2x128x128xbf16, #tpu.memory_space<vmem>>, vector<1x128x128xbf16>
    %68 = vector.shape_cast %67 : vector<1x128x128xbf16> to vector<128x128xbf16>
    %69 = arith.truncf %66 : vector<16x128xf32> to vector<16x128xbf16>
    %cst_28 = arith.constant dense<0.000000e+00> : vector<16x128xf32>
    %70 = tpu.matmul %69, %68, %cst_28 {dimension_numbers = #tpu.dot_dimension_numbers<[1], [0], [0], [1], [0, 0, 1, 1], [], []>} : vector<16x128xbf16>, vector<128x128xbf16>, vector<16x128xf32> -> vector<16x128xf32>
    %c0_29 = arith.constant 0 : index
    %c0_30 = arith.constant 0 : index
    %c0_31 = arith.constant 0 : index
    %71 = vector.load %arg9[%c0_29, %c0_30, %c0_31] : memref<2x1x128xf32, #tpu.memory_space<vmem>>, vector<1x1x128xf32>
    %72 = vector.shape_cast %71 : vector<1x1x128xf32> to vector<1x128xf32>
    %73 = vector.broadcast %72 : vector<1x128xf32> to vector<16x128xf32>
    %74 = arith.addf %70, %73 : vector<16x128xf32>
    %75 = arith.addf %74, %24 : vector<16x128xf32>
    %c0_32 = arith.constant 0 : index
    %c0_33 = arith.constant 0 : index
    %c0_34 = arith.constant 0 : index
    %76 = vector.load %arg10[%c0_32, %c0_33, %c0_34] : memref<2x1x128xf32, #tpu.memory_space<vmem>>, vector<1x1x128xf32>
    %77 = vector.shape_cast %76 : vector<1x1x128xf32> to vector<1x128xf32>
    %c0_35 = arith.constant 0 : index
    %c0_36 = arith.constant 0 : index
    %c0_37 = arith.constant 0 : index
    %78 = vector.load %arg11[%c0_35, %c0_36, %c0_37] : memref<2x1x128xf32, #tpu.memory_space<vmem>>, vector<1x1x128xf32>
    %79 = vector.shape_cast %78 : vector<1x1x128xf32> to vector<1x128xf32>
    %cst_38 = arith.constant dense<0.000000e+00> : vector<16xf32>
    %80 = vector.multi_reduction <add>, %75, %cst_38 [1] : vector<16x128xf32> to vector<16xf32>
    %81 = vector.shape_cast %80 : vector<16xf32> to vector<16x1xf32>
    %cst_39 = arith.constant 1.280000e+02 : f32
    %82 = vector.broadcast %cst_39 : f32 to vector<16x1xf32>
    %83 = arith.divf %81, %82 : vector<16x1xf32>
    %84 = vector.broadcast %83 : vector<16x1xf32> to vector<16x128xf32>
    %85 = arith.subf %75, %84 : vector<16x128xf32>
    %86 = arith.mulf %85, %85 : vector<16x128xf32>
    %cst_40 = arith.constant dense<0.000000e+00> : vector<16xf32>
    %87 = vector.multi_reduction <add>, %86, %cst_40 [1] : vector<16x128xf32> to vector<16xf32>
    %88 = vector.shape_cast %87 : vector<16xf32> to vector<16x1xf32>
    %cst_41 = arith.constant 1.280000e+02 : f32
    %89 = vector.broadcast %cst_41 : f32 to vector<16x1xf32>
    %90 = arith.divf %88, %89 : vector<16x1xf32>
    %91 = vector.broadcast %83 : vector<16x1xf32> to vector<16x128xf32>
    %92 = arith.subf %75, %91 : vector<16x128xf32>
    %cst_42 = arith.constant 9.99999996E-13 : f32
    %93 = vector.broadcast %cst_42 : f32 to vector<16x1xf32>
    %94 = arith.addf %90, %93 : vector<16x1xf32>
    %95 = math.rsqrt %94 : vector<16x1xf32>
    %96 = vector.broadcast %95 : vector<16x1xf32> to vector<16x128xf32>
    %97 = arith.mulf %92, %96 : vector<16x128xf32>
    %98 = vector.broadcast %77 : vector<1x128xf32> to vector<16x128xf32>
    %99 = arith.mulf %97, %98 : vector<16x128xf32>
    %100 = vector.broadcast %79 : vector<1x128xf32> to vector<16x128xf32>
    %101 = arith.addf %99, %100 : vector<16x128xf32>
    %c0_43 = arith.constant 0 : index
    %c0_44 = arith.constant 0 : index
    %c0_45 = arith.constant 0 : index
    %102 = vector.load %arg12[%c0_43, %c0_44, %c0_45] : memref<2x128x256xbf16, #tpu.memory_space<vmem>>, vector<1x128x256xbf16>
    %103 = vector.shape_cast %102 : vector<1x128x256xbf16> to vector<128x256xbf16>
    %104 = arith.truncf %101 : vector<16x128xf32> to vector<16x128xbf16>
    %cst_46 = arith.constant dense<0.000000e+00> : vector<16x256xf32>
    %105 = tpu.matmul %104, %103, %cst_46 {dimension_numbers = #tpu.dot_dimension_numbers<[1], [0], [0], [1], [0, 0, 1, 1], [], []>} : vector<16x128xbf16>, vector<128x256xbf16>, vector<16x256xf32> -> vector<16x256xf32>
    %c0_47 = arith.constant 0 : index
    %c0_48 = arith.constant 0 : index
    %c0_49 = arith.constant 0 : index
    %106 = vector.load %arg13[%c0_47, %c0_48, %c0_49] : memref<2x1x256xf32, #tpu.memory_space<vmem>>, vector<1x1x256xf32>
    %107 = vector.shape_cast %106 : vector<1x1x256xf32> to vector<1x256xf32>
    %108 = vector.broadcast %107 : vector<1x256xf32> to vector<16x256xf32>
    %109 = arith.addf %105, %108 : vector<16x256xf32>
    %cst_50 = arith.constant 5.000000e-01 : f32
    %110 = vector.broadcast %cst_50 : f32 to vector<16x256xf32>
    %111 = arith.mulf %110, %109 : vector<16x256xf32>
    %cst_51 = arith.constant 4.471500e-02 : f32
    %112 = vector.broadcast %cst_51 : f32 to vector<16x256xf32>
    %113 = arith.mulf %112, %109 : vector<16x256xf32>
    %114 = arith.mulf %113, %109 : vector<16x256xf32>
    %115 = arith.mulf %114, %109 : vector<16x256xf32>
    %116 = arith.addf %109, %115 : vector<16x256xf32>
    %cst_52 = arith.constant 0.797884583 : f32
    %117 = vector.broadcast %cst_52 : f32 to vector<16x256xf32>
    %118 = arith.mulf %117, %116 : vector<16x256xf32>
    %119 = math.tanh %118 : vector<16x256xf32>
    %cst_53 = arith.constant 1.000000e+00 : f32
    %120 = vector.broadcast %cst_53 : f32 to vector<16x256xf32>
    %121 = arith.addf %120, %119 : vector<16x256xf32>
    %122 = arith.mulf %111, %121 : vector<16x256xf32>
    %c0_54 = arith.constant 0 : index
    %c0_55 = arith.constant 0 : index
    %c0_56 = arith.constant 0 : index
    %123 = vector.load %arg14[%c0_54, %c0_55, %c0_56] : memref<2x256x128xbf16, #tpu.memory_space<vmem>>, vector<1x256x128xbf16>
    %124 = vector.shape_cast %123 : vector<1x256x128xbf16> to vector<256x128xbf16>
    %125 = arith.truncf %122 : vector<16x256xf32> to vector<16x256xbf16>
    %cst_57 = arith.constant dense<0.000000e+00> : vector<16x128xf32>
    %126 = tpu.matmul %125, %124, %cst_57 {dimension_numbers = #tpu.dot_dimension_numbers<[1], [0], [0], [1], [0, 0, 1, 1], [], []>} : vector<16x256xbf16>, vector<256x128xbf16>, vector<16x128xf32> -> vector<16x128xf32>
    %c0_58 = arith.constant 0 : index
    %c0_59 = arith.constant 0 : index
    %c0_60 = arith.constant 0 : index
    %127 = vector.load %arg15[%c0_58, %c0_59, %c0_60] : memref<2x1x128xf32, #tpu.memory_space<vmem>>, vector<1x1x128xf32>
    %128 = vector.shape_cast %127 : vector<1x1x128xf32> to vector<1x128xf32>
    %129 = vector.broadcast %128 : vector<1x128xf32> to vector<16x128xf32>
    %130 = arith.addf %126, %129 : vector<16x128xf32>
    %131 = arith.addf %130, %101 : vector<16x128xf32>
    %c0_61 = arith.constant 0 : index
    %c0_62 = arith.constant 0 : index
    %c0_63 = arith.constant 0 : index
    %132 = vector.load %arg16[%c0_61, %c0_62, %c0_63] : memref<2x1x128xf32, #tpu.memory_space<vmem>>, vector<1x1x128xf32>
    %133 = vector.shape_cast %132 : vector<1x1x128xf32> to vector<1x128xf32>
    %c0_64 = arith.constant 0 : index
    %c0_65 = arith.constant 0 : index
    %c0_66 = arith.constant 0 : index
    %134 = vector.load %arg17[%c0_64, %c0_65, %c0_66] : memref<2x1x128xf32, #tpu.memory_space<vmem>>, vector<1x1x128xf32>
    %135 = vector.shape_cast %134 : vector<1x1x128xf32> to vector<1x128xf32>
    %cst_67 = arith.constant dense<0.000000e+00> : vector<16xf32>
    %136 = vector.multi_reduction <add>, %131, %cst_67 [1] : vector<16x128xf32> to vector<16xf32>
    %137 = vector.shape_cast %136 : vector<16xf32> to vector<16x1xf32>
    %cst_68 = arith.constant 1.280000e+02 : f32
    %138 = vector.broadcast %cst_68 : f32 to vector<16x1xf32>
    %139 = arith.divf %137, %138 : vector<16x1xf32>
    %140 = vector.broadcast %139 : vector<16x1xf32> to vector<16x128xf32>
    %141 = arith.subf %131, %140 : vector<16x128xf32>
    %142 = arith.mulf %141, %141 : vector<16x128xf32>
    %cst_69 = arith.constant dense<0.000000e+00> : vector<16xf32>
    %143 = vector.multi_reduction <add>, %142, %cst_69 [1] : vector<16x128xf32> to vector<16xf32>
    %144 = vector.shape_cast %143 : vector<16xf32> to vector<16x1xf32>
    %cst_70 = arith.constant 1.280000e+02 : f32
    %145 = vector.broadcast %cst_70 : f32 to vector<16x1xf32>
    %146 = arith.divf %144, %145 : vector<16x1xf32>
    %147 = vector.broadcast %139 : vector<16x1xf32> to vector<16x128xf32>
    %148 = arith.subf %131, %147 : vector<16x128xf32>
    %cst_71 = arith.constant 9.99999996E-13 : f32
    %149 = vector.broadcast %cst_71 : f32 to vector<16x1xf32>
    %150 = arith.addf %146, %149 : vector<16x1xf32>
    %151 = math.rsqrt %150 : vector<16x1xf32>
    %152 = vector.broadcast %151 : vector<16x1xf32> to vector<16x128xf32>
    %153 = arith.mulf %148, %152 : vector<16x128xf32>
    %154 = vector.broadcast %133 : vector<1x128xf32> to vector<16x128xf32>
    %155 = arith.mulf %153, %154 : vector<16x128xf32>
    %156 = vector.broadcast %135 : vector<1x128xf32> to vector<16x128xf32>
    %157 = arith.addf %155, %156 : vector<16x128xf32>
    %c1 = arith.constant 1 : index
    %c0_72 = arith.constant 0 : index
    %c0_73 = arith.constant 0 : index
    %158 = vector.load %arg6[%c1, %c0_72, %c0_73] : memref<2x128x384xbf16, #tpu.memory_space<vmem>>, vector<1x128x384xbf16>
    %159 = vector.shape_cast %158 : vector<1x128x384xbf16> to vector<128x384xbf16>
    %160 = arith.truncf %157 : vector<16x128xf32> to vector<16x128xbf16>
    %cst_74 = arith.constant dense<0.000000e+00> : vector<16x384xf32>
    %161 = tpu.matmul %160, %159, %cst_74 {dimension_numbers = #tpu.dot_dimension_numbers<[1], [0], [0], [1], [0, 0, 1, 1], [], []>} : vector<16x128xbf16>, vector<128x384xbf16>, vector<16x384xf32> -> vector<16x384xf32>
    %c1_75 = arith.constant 1 : index
    %c0_76 = arith.constant 0 : index
    %c0_77 = arith.constant 0 : index
    %162 = vector.load %arg7[%c1_75, %c0_76, %c0_77] : memref<2x1x384xf32, #tpu.memory_space<vmem>>, vector<1x1x384xf32>
    %163 = vector.shape_cast %162 : vector<1x1x384xf32> to vector<1x384xf32>
    %164 = vector.broadcast %163 : vector<1x384xf32> to vector<16x384xf32>
    %165 = arith.addf %161, %164 : vector<16x384xf32>
    %166 = vector.extract_strided_slice %165 {offsets = [0, 0], sizes = [16, 128], strides = [1, 1]} : vector<16x384xf32> to vector<16x128xf32>
    %167 = vector.extract_strided_slice %165 {offsets = [0, 128], sizes = [16, 128], strides = [1, 1]} : vector<16x384xf32> to vector<16x128xf32>
    %168 = arith.truncf %167 : vector<16x128xf32> to vector<16x128xbf16>
    %169 = vector.extract_strided_slice %165 {offsets = [0, 256], sizes = [16, 128], strides = [1, 1]} : vector<16x384xf32> to vector<16x128xf32>
    %170 = arith.truncf %169 : vector<16x128xf32> to vector<16x128xbf16>
    %171 = tpu.concatenate %166, %166, %166, %166 in 0 : vector<16x128xf32>, vector<16x128xf32>, vector<16x128xf32>, vector<16x128xf32> -> vector<64x128xf32>
    %172 = arith.mulf %171, %26 : vector<64x128xf32>
    %173 = arith.truncf %172 : vector<64x128xf32> to vector<64x128xbf16>
    %cst_78 = arith.constant dense<0.000000e+00> : vector<64x16xf32>
    %174 = tpu.matmul %173, %168, %cst_78 {dimension_numbers = #tpu.dot_dimension_numbers<[1], [1], [0], [0], [0, 0, 1, 0], [], []>} : vector<64x128xbf16>, vector<16x128xbf16>, vector<64x16xf32> -> vector<64x16xf32>
    %cst_79 = arith.constant 0.176776692 : f32
    %175 = vector.broadcast %cst_79 : f32 to vector<64x16xf32>
    %176 = arith.mulf %174, %175 : vector<64x16xf32>
    %177 = arith.addf %176, %25 : vector<64x16xf32>
    %cst_80 = arith.constant dense<0xFF800000> : vector<64xf32>
    %178 = vector.multi_reduction <maximumf>, %177, %cst_80 [1] : vector<64x16xf32> to vector<64xf32>
    %179 = vector.shape_cast %178 : vector<64xf32> to vector<64x1xf32>
    %180 = vector.broadcast %179 : vector<64x1xf32> to vector<64x16xf32>
    %181 = arith.subf %177, %180 : vector<64x16xf32>
    %182 = math.exp %181 : vector<64x16xf32>
    %cst_81 = arith.constant dense<0.000000e+00> : vector<64xf32>
    %183 = vector.multi_reduction <add>, %182, %cst_81 [1] : vector<64x16xf32> to vector<64xf32>
    %184 = vector.shape_cast %183 : vector<64xf32> to vector<64x1xf32>
    %185 = tpu.reciprocal %184 {approx = true} : vector<64x1xf32> -> vector<64x1xf32>
    %186 = vector.broadcast %185 : vector<64x1xf32> to vector<64x16xf32>
    %187 = arith.mulf %182, %186 : vector<64x16xf32>
    %188 = arith.truncf %187 : vector<64x16xf32> to vector<64x16xbf16>
    %cst_82 = arith.constant dense<0.000000e+00> : vector<64x128xf32>
    %189 = tpu.matmul %188, %170, %cst_82 {dimension_numbers = #tpu.dot_dimension_numbers<[1], [0], [0], [1], [0, 0, 1, 1], [], []>} : vector<64x16xbf16>, vector<16x128xbf16>, vector<64x128xf32> -> vector<64x128xf32>
    %190 = arith.mulf %189, %26 : vector<64x128xf32>
    %191 = vector.extract_strided_slice %190 {offsets = [0, 0], sizes = [16, 128], strides = [1, 1]} : vector<64x128xf32> to vector<16x128xf32>
    %192 = vector.extract_strided_slice %190 {offsets = [16, 0], sizes = [16, 128], strides = [1, 1]} : vector<64x128xf32> to vector<16x128xf32>
    %193 = arith.addf %191, %192 : vector<16x128xf32>
    %194 = vector.extract_strided_slice %190 {offsets = [32, 0], sizes = [16, 128], strides = [1, 1]} : vector<64x128xf32> to vector<16x128xf32>
    %195 = arith.addf %193, %194 : vector<16x128xf32>
    %196 = vector.extract_strided_slice %190 {offsets = [48, 0], sizes = [16, 128], strides = [1, 1]} : vector<64x128xf32> to vector<16x128xf32>
    %197 = arith.addf %195, %196 : vector<16x128xf32>
    %c1_83 = arith.constant 1 : index
    %c0_84 = arith.constant 0 : index
    %c0_85 = arith.constant 0 : index
    %198 = vector.load %arg8[%c1_83, %c0_84, %c0_85] : memref<2x128x128xbf16, #tpu.memory_space<vmem>>, vector<1x128x128xbf16>
    %199 = vector.shape_cast %198 : vector<1x128x128xbf16> to vector<128x128xbf16>
    %200 = arith.truncf %197 : vector<16x128xf32> to vector<16x128xbf16>
    %cst_86 = arith.constant dense<0.000000e+00> : vector<16x128xf32>
    %201 = tpu.matmul %200, %199, %cst_86 {dimension_numbers = #tpu.dot_dimension_numbers<[1], [0], [0], [1], [0, 0, 1, 1], [], []>} : vector<16x128xbf16>, vector<128x128xbf16>, vector<16x128xf32> -> vector<16x128xf32>
    %c1_87 = arith.constant 1 : index
    %c0_88 = arith.constant 0 : index
    %c0_89 = arith.constant 0 : index
    %202 = vector.load %arg9[%c1_87, %c0_88, %c0_89] : memref<2x1x128xf32, #tpu.memory_space<vmem>>, vector<1x1x128xf32>
    %203 = vector.shape_cast %202 : vector<1x1x128xf32> to vector<1x128xf32>
    %204 = vector.broadcast %203 : vector<1x128xf32> to vector<16x128xf32>
    %205 = arith.addf %201, %204 : vector<16x128xf32>
    %206 = arith.addf %205, %157 : vector<16x128xf32>
    %c1_90 = arith.constant 1 : index
    %c0_91 = arith.constant 0 : index
    %c0_92 = arith.constant 0 : index
    %207 = vector.load %arg10[%c1_90, %c0_91, %c0_92] : memref<2x1x128xf32, #tpu.memory_space<vmem>>, vector<1x1x128xf32>
    %208 = vector.shape_cast %207 : vector<1x1x128xf32> to vector<1x128xf32>
    %c1_93 = arith.constant 1 : index
    %c0_94 = arith.constant 0 : index
    %c0_95 = arith.constant 0 : index
    %209 = vector.load %arg11[%c1_93, %c0_94, %c0_95] : memref<2x1x128xf32, #tpu.memory_space<vmem>>, vector<1x1x128xf32>
    %210 = vector.shape_cast %209 : vector<1x1x128xf32> to vector<1x128xf32>
    %cst_96 = arith.constant dense<0.000000e+00> : vector<16xf32>
    %211 = vector.multi_reduction <add>, %206, %cst_96 [1] : vector<16x128xf32> to vector<16xf32>
    %212 = vector.shape_cast %211 : vector<16xf32> to vector<16x1xf32>
    %cst_97 = arith.constant 1.280000e+02 : f32
    %213 = vector.broadcast %cst_97 : f32 to vector<16x1xf32>
    %214 = arith.divf %212, %213 : vector<16x1xf32>
    %215 = vector.broadcast %214 : vector<16x1xf32> to vector<16x128xf32>
    %216 = arith.subf %206, %215 : vector<16x128xf32>
    %217 = arith.mulf %216, %216 : vector<16x128xf32>
    %cst_98 = arith.constant dense<0.000000e+00> : vector<16xf32>
    %218 = vector.multi_reduction <add>, %217, %cst_98 [1] : vector<16x128xf32> to vector<16xf32>
    %219 = vector.shape_cast %218 : vector<16xf32> to vector<16x1xf32>
    %cst_99 = arith.constant 1.280000e+02 : f32
    %220 = vector.broadcast %cst_99 : f32 to vector<16x1xf32>
    %221 = arith.divf %219, %220 : vector<16x1xf32>
    %222 = vector.broadcast %214 : vector<16x1xf32> to vector<16x128xf32>
    %223 = arith.subf %206, %222 : vector<16x128xf32>
    %cst_100 = arith.constant 9.99999996E-13 : f32
    %224 = vector.broadcast %cst_100 : f32 to vector<16x1xf32>
    %225 = arith.addf %221, %224 : vector<16x1xf32>
    %226 = math.rsqrt %225 : vector<16x1xf32>
    %227 = vector.broadcast %226 : vector<16x1xf32> to vector<16x128xf32>
    %228 = arith.mulf %223, %227 : vector<16x128xf32>
    %229 = vector.broadcast %208 : vector<1x128xf32> to vector<16x128xf32>
    %230 = arith.mulf %228, %229 : vector<16x128xf32>
    %231 = vector.broadcast %210 : vector<1x128xf32> to vector<16x128xf32>
    %232 = arith.addf %230, %231 : vector<16x128xf32>
    %c1_101 = arith.constant 1 : index
    %c0_102 = arith.constant 0 : index
    %c0_103 = arith.constant 0 : index
    %233 = vector.load %arg12[%c1_101, %c0_102, %c0_103] : memref<2x128x256xbf16, #tpu.memory_space<vmem>>, vector<1x128x256xbf16>
    %234 = vector.shape_cast %233 : vector<1x128x256xbf16> to vector<128x256xbf16>
    %235 = arith.truncf %232 : vector<16x128xf32> to vector<16x128xbf16>
    %cst_104 = arith.constant dense<0.000000e+00> : vector<16x256xf32>
    %236 = tpu.matmul %235, %234, %cst_104 {dimension_numbers = #tpu.dot_dimension_numbers<[1], [0], [0], [1], [0, 0, 1, 1], [], []>} : vector<16x128xbf16>, vector<128x256xbf16>, vector<16x256xf32> -> vector<16x256xf32>
    %c1_105 = arith.constant 1 : index
    %c0_106 = arith.constant 0 : index
    %c0_107 = arith.constant 0 : index
    %237 = vector.load %arg13[%c1_105, %c0_106, %c0_107] : memref<2x1x256xf32, #tpu.memory_space<vmem>>, vector<1x1x256xf32>
    %238 = vector.shape_cast %237 : vector<1x1x256xf32> to vector<1x256xf32>
    %239 = vector.broadcast %238 : vector<1x256xf32> to vector<16x256xf32>
    %240 = arith.addf %236, %239 : vector<16x256xf32>
    %cst_108 = arith.constant 5.000000e-01 : f32
    %241 = vector.broadcast %cst_108 : f32 to vector<16x256xf32>
    %242 = arith.mulf %241, %240 : vector<16x256xf32>
    %cst_109 = arith.constant 4.471500e-02 : f32
    %243 = vector.broadcast %cst_109 : f32 to vector<16x256xf32>
    %244 = arith.mulf %243, %240 : vector<16x256xf32>
    %245 = arith.mulf %244, %240 : vector<16x256xf32>
    %246 = arith.mulf %245, %240 : vector<16x256xf32>
    %247 = arith.addf %240, %246 : vector<16x256xf32>
    %cst_110 = arith.constant 0.797884583 : f32
    %248 = vector.broadcast %cst_110 : f32 to vector<16x256xf32>
    %249 = arith.mulf %248, %247 : vector<16x256xf32>
    %250 = math.tanh %249 : vector<16x256xf32>
    %cst_111 = arith.constant 1.000000e+00 : f32
    %251 = vector.broadcast %cst_111 : f32 to vector<16x256xf32>
    %252 = arith.addf %251, %250 : vector<16x256xf32>
    %253 = arith.mulf %242, %252 : vector<16x256xf32>
    %c1_112 = arith.constant 1 : index
    %c0_113 = arith.constant 0 : index
    %c0_114 = arith.constant 0 : index
    %254 = vector.load %arg14[%c1_112, %c0_113, %c0_114] : memref<2x256x128xbf16, #tpu.memory_space<vmem>>, vector<1x256x128xbf16>
    %255 = vector.shape_cast %254 : vector<1x256x128xbf16> to vector<256x128xbf16>
    %256 = arith.truncf %253 : vector<16x256xf32> to vector<16x256xbf16>
    %cst_115 = arith.constant dense<0.000000e+00> : vector<16x128xf32>
    %257 = tpu.matmul %256, %255, %cst_115 {dimension_numbers = #tpu.dot_dimension_numbers<[1], [0], [0], [1], [0, 0, 1, 1], [], []>} : vector<16x256xbf16>, vector<256x128xbf16>, vector<16x128xf32> -> vector<16x128xf32>
    %c1_116 = arith.constant 1 : index
    %c0_117 = arith.constant 0 : index
    %c0_118 = arith.constant 0 : index
    %258 = vector.load %arg15[%c1_116, %c0_117, %c0_118] : memref<2x1x128xf32, #tpu.memory_space<vmem>>, vector<1x1x128xf32>
    %259 = vector.shape_cast %258 : vector<1x1x128xf32> to vector<1x128xf32>
    %260 = vector.broadcast %259 : vector<1x128xf32> to vector<16x128xf32>
    %261 = arith.addf %257, %260 : vector<16x128xf32>
    %262 = arith.addf %261, %232 : vector<16x128xf32>
    %c1_119 = arith.constant 1 : index
    %c0_120 = arith.constant 0 : index
    %c0_121 = arith.constant 0 : index
    %263 = vector.load %arg16[%c1_119, %c0_120, %c0_121] : memref<2x1x128xf32, #tpu.memory_space<vmem>>, vector<1x1x128xf32>
    %264 = vector.shape_cast %263 : vector<1x1x128xf32> to vector<1x128xf32>
    %c1_122 = arith.constant 1 : index
    %c0_123 = arith.constant 0 : index
    %c0_124 = arith.constant 0 : index
    %265 = vector.load %arg17[%c1_122, %c0_123, %c0_124] : memref<2x1x128xf32, #tpu.memory_space<vmem>>, vector<1x1x128xf32>
    %266 = vector.shape_cast %265 : vector<1x1x128xf32> to vector<1x128xf32>
    %cst_125 = arith.constant dense<0.000000e+00> : vector<16xf32>
    %267 = vector.multi_reduction <add>, %262, %cst_125 [1] : vector<16x128xf32> to vector<16xf32>
    %268 = vector.shape_cast %267 : vector<16xf32> to vector<16x1xf32>
    %cst_126 = arith.constant 1.280000e+02 : f32
    %269 = vector.broadcast %cst_126 : f32 to vector<16x1xf32>
    %270 = arith.divf %268, %269 : vector<16x1xf32>
    %271 = vector.broadcast %270 : vector<16x1xf32> to vector<16x128xf32>
    %272 = arith.subf %262, %271 : vector<16x128xf32>
    %273 = arith.mulf %272, %272 : vector<16x128xf32>
    %cst_127 = arith.constant dense<0.000000e+00> : vector<16xf32>
    %274 = vector.multi_reduction <add>, %273, %cst_127 [1] : vector<16x128xf32> to vector<16xf32>
    %275 = vector.shape_cast %274 : vector<16xf32> to vector<16x1xf32>
    %cst_128 = arith.constant 1.280000e+02 : f32
    %276 = vector.broadcast %cst_128 : f32 to vector<16x1xf32>
    %277 = arith.divf %275, %276 : vector<16x1xf32>
    %278 = vector.broadcast %270 : vector<16x1xf32> to vector<16x128xf32>
    %279 = arith.subf %262, %278 : vector<16x128xf32>
    %cst_129 = arith.constant 9.99999996E-13 : f32
    %280 = vector.broadcast %cst_129 : f32 to vector<16x1xf32>
    %281 = arith.addf %277, %280 : vector<16x1xf32>
    %282 = math.rsqrt %281 : vector<16x1xf32>
    %283 = vector.broadcast %282 : vector<16x1xf32> to vector<16x128xf32>
    %284 = arith.mulf %279, %283 : vector<16x128xf32>
    %285 = vector.broadcast %264 : vector<1x128xf32> to vector<16x128xf32>
    %286 = arith.mulf %284, %285 : vector<16x128xf32>
    %287 = vector.broadcast %266 : vector<1x128xf32> to vector<16x128xf32>
    %288 = arith.addf %286, %287 : vector<16x128xf32>
    %c0_130 = arith.constant 0 : index
    %c0_131 = arith.constant 0 : index
    %289 = vector.load %arg3[%c0_130, %c0_131] : memref<2x16xf32, #tpu.memory_space<vmem>>, vector<2x16xf32>
    %cst_132 = arith.constant dense<0.000000e+00> : vector<2x128xf32>
    %290 = tpu.matmul %289, %288, %cst_132 {dimension_numbers = #tpu.dot_dimension_numbers<[1], [0], [0], [1], [0, 0, 1, 1], [], []>} : vector<2x16xf32>, vector<16x128xf32>, vector<2x128xf32> -> vector<2x128xf32>
    %c0_133 = arith.constant 0 : index
    %c0_134 = arith.constant 0 : index
    %291 = vector.load %arg18[%c0_133, %c0_134] : memref<128x128xbf16, #tpu.memory_space<vmem>>, vector<128x128xbf16>
    %292 = arith.truncf %290 : vector<2x128xf32> to vector<2x128xbf16>
    %cst_135 = arith.constant dense<0.000000e+00> : vector<2x128xf32>
    %293 = tpu.matmul %292, %291, %cst_135 {dimension_numbers = #tpu.dot_dimension_numbers<[1], [0], [0], [1], [0, 0, 1, 1], [], []>} : vector<2x128xbf16>, vector<128x128xbf16>, vector<2x128xf32> -> vector<2x128xf32>
    %c0_136 = arith.constant 0 : index
    %c0_137 = arith.constant 0 : index
    %294 = vector.load %arg19[%c0_136, %c0_137] : memref<1x128xf32, #tpu.memory_space<vmem>>, vector<1x128xf32>
    %295 = vector.broadcast %294 : vector<1x128xf32> to vector<2x128xf32>
    %296 = arith.addf %293, %295 : vector<2x128xf32>
    %cst_138 = arith.constant 5.000000e-01 : f32
    %297 = vector.broadcast %cst_138 : f32 to vector<2x128xf32>
    %298 = arith.mulf %297, %296 : vector<2x128xf32>
    %cst_139 = arith.constant 4.471500e-02 : f32
    %299 = vector.broadcast %cst_139 : f32 to vector<2x128xf32>
    %300 = arith.mulf %299, %296 : vector<2x128xf32>
    %301 = arith.mulf %300, %296 : vector<2x128xf32>
    %302 = arith.mulf %301, %296 : vector<2x128xf32>
    %303 = arith.addf %296, %302 : vector<2x128xf32>
    %cst_140 = arith.constant 0.797884583 : f32
    %304 = vector.broadcast %cst_140 : f32 to vector<2x128xf32>
    %305 = arith.mulf %304, %303 : vector<2x128xf32>
    %306 = math.tanh %305 : vector<2x128xf32>
    %cst_141 = arith.constant 1.000000e+00 : f32
    %307 = vector.broadcast %cst_141 : f32 to vector<2x128xf32>
    %308 = arith.addf %307, %306 : vector<2x128xf32>
    %309 = arith.mulf %298, %308 : vector<2x128xf32>
    %c0_142 = arith.constant 0 : index
    %c0_143 = arith.constant 0 : index
    %310 = vector.load %arg20[%c0_142, %c0_143] : memref<128x128xbf16, #tpu.memory_space<vmem>>, vector<128x128xbf16>
    %311 = arith.truncf %309 : vector<2x128xf32> to vector<2x128xbf16>
    %cst_144 = arith.constant dense<0.000000e+00> : vector<2x128xf32>
    %312 = tpu.matmul %311, %310, %cst_144 {dimension_numbers = #tpu.dot_dimension_numbers<[1], [0], [0], [1], [0, 0, 1, 1], [], []>} : vector<2x128xbf16>, vector<128x128xbf16>, vector<2x128xf32> -> vector<2x128xf32>
    %c0_145 = arith.constant 0 : index
    %c0_146 = arith.constant 0 : index
    %313 = vector.load %arg21[%c0_145, %c0_146] : memref<1x128xf32, #tpu.memory_space<vmem>>, vector<1x128xf32>
    %314 = vector.broadcast %313 : vector<1x128xf32> to vector<2x128xf32>
    %315 = arith.addf %312, %314 : vector<2x128xf32>
    %316 = arith.mulf %315, %315 : vector<2x128xf32>
    %cst_147 = arith.constant dense<0.000000e+00> : vector<2xf32>
    %317 = vector.multi_reduction <add>, %316, %cst_147 [1] : vector<2x128xf32> to vector<2xf32>
    %318 = vector.shape_cast %317 : vector<2xf32> to vector<2x1xf32>
    %cst_148 = arith.constant 1.000000e-24 : f32
    %319 = vector.broadcast %cst_148 : f32 to vector<2x1xf32>
    %320 = arith.maximumf %318, %319 : vector<2x1xf32>
    %321 = math.rsqrt %320 : vector<2x1xf32>
    %322 = vector.broadcast %321 : vector<2x1xf32> to vector<2x128xf32>
    %323 = arith.mulf %315, %322 : vector<2x128xf32>
    %c0_149 = arith.constant 0 : index
    %c0_150 = arith.constant 0 : index
    %324 = vector.load %arg22[%c0_149, %c0_150] : memref<2x128xf32, #tpu.memory_space<vmem>>, vector<2x128xf32>
    tpu.vector_store %arg22[%c0_149, %c0_150], %323 {strides = array<i32>} : memref<2x128xf32, #tpu.memory_space<vmem>>, vector<2x128xf32>,
    return
  }
}

</mosaic_0001>

<bundles_post_ra>
// kernel: transformer_embeddings_forward.1
= control target key start
LH: loop header
LB: loop body
LE: loop exit
PB: predicated region body
PF: predicated region fallthrough
CT: control target
= control target key end

     0   :  { %s3924_s0 = inlined_call_operand.vmem [shape: f32[16,128], index: 0, kind: input, shape index: {}]   ;;  %s3925_s1 = inlined_call_operand.vmem [shape: f32[64,16], index: 1, kind: input, shape index: {}]   ;;  %s3926_s2 = inlined_call_operand.vmem [shape: f32[64,128], index: 2, kind: input, shape index: {}]   ;;  %s3927_s3 = inlined_call_operand.vmem [shape: f32[2,16], index: 3, kind: input, shape index: {}]   ;;  %s3928_s4 = inlined_call_operand.vmem [shape: f32[1,128], index: 4, kind: input, shape index: {}]   ;;  %s3929_s5 = inlined_call_operand.vmem [shape: f32[1,128], index: 5, kind: input, shape index: {}]   ;;  %s3930_s6 = inlined_call_operand.hbm [shape: bf16[2,128,384], index: 6, kind: input, shape index: {}]   ;;  %s3931_s7 = inlined_call_operand.vmem [shape: f32[2,1,384], index: 7, kind: input, shape index: {}]   ;;  %s3932_s8 = inlined_call_operand.vmem [shape: bf16[2,128,128], index: 8, kind: input, shape index: {}]   ;;  %s3933_s9 = inlined_call_operand.vmem [shape: f32[2,1,128], index: 9, kind: input, shape index: {}]   ;;  %s3934_s10 = inlined_call_operand.vmem [shape: f32[2,1,128], index: 10, kind: input, shape index: {}]   ;;  %s3935_s11 = inlined_call_operand.vmem [shape: f32[2,1,128], index: 11, kind: input, shape index: {}]   ;;  %s3936_s12 = inlined_call_operand.hbm [shape: bf16[2,128,256], index: 12, kind: input, shape index: {}]   ;;  %s3937_s13 = inlined_call_operand.vmem [shape: f32[2,1,256], index: 13, kind: input, shape index: {}]   ;;  %s3938_s14 = inlined_call_operand.hbm [shape: bf16[2,256,128], index: 14, kind: input, shape index: {}]   ;;  %s3939_s15 = inlined_call_operand.vmem [shape: f32[2,1,128], index: 15, kind: input, shape index: {}]   ;;  %s3940_s16 = inlined_call_operand.vmem [shape: f32[2,1,128], index: 16, kind: input, shape index: {}]   ;;  %s3941_s17 = inlined_call_operand.vmem [shape: f32[2,1,128], index: 17, kind: input, shape index: {}]   ;;  %s3942_s18 = inlined_call_operand.vmem [shape: bf16[128,128], index: 18, kind: input, shape index: {}]   ;;  %s3943_s19 = inlined_call_operand.vmem [shape: f32[1,128], index: 19, kind: input, shape index: {}]   ;;  %s3944_s20 = inlined_call_operand.vmem [shape: bf16[128,128], index: 20, kind: input, shape index: {}]   ;;  %s3945_s21 = inlined_call_operand.vmem [shape: f32[1,128], index: 21, kind: input, shape index: {}]   ;;  %s3946_s22 = inlined_call_operand.hbm [shape: f32[2,128], index: 22, kind: output, shape index: {}]  }
   0x1   :  { %3950 = sst [smem:[#allocation12_spill]] %s3924_s0 }
   0x2   :  { %3951 = sst [smem:[#allocation13_spill]] %s3925_s1 }
   0x3   :  { %3952 = sst [smem:[#allocation14_spill]] %s3926_s2 }
   0x4   :  { %3953 = sst [smem:[#allocation15_spill]] %s3927_s3 }
   0x5   :  { %3954 = sst [smem:[#allocation16_spill]] %s3928_s4 }
   0x6   :  { %3955 = sst [smem:[#allocation17_spill]] %s3929_s5 }
   0x7   :  { %3956 = sst [smem:[#allocation18_spill]] %s3930_s6 }
   0x8   :  { %3957 = sst [smem:[#allocation19_spill]] %s3946_s22 }
   0x9   :  { %27 = vsyncpa [#allocation3], 0 }
   0xa   :  { %28 = vsyncpa [#allocation6], 0  ;;  %s69_s29 = sshll.u32 %s3936_s12, 4  ;;  %s70_s29 = int_to_ptr.hbm [resolvable:$true] %s69_s29 }
   0xb   :  { %29 = vsyncpa [#allocation4], 0  ;;  %s3322_s30 = smov [#allocation5]   ;;  %s3958_s1 = sld [smem:[#allocation18_spill]] }
   0xc   :  { %s71_s4 = sshll.u32 %s3322_s30, 4  ;;  %s3323_s24 = smov 128   ;;  %s72_s4 = int_to_ptr.vmem [resolvable:$true] %s71_s4 }
   0xd   :  { %s3324_s6 = smov 8   ;;  %s3325_s25 = smov [#allocation2]  }
   0xe   :  { %77 = dma.hbm_to_vmem [thread:$0]  %s70_s29, 4096, %s72_s4, [#allocation6], %s3323_s24, %s3323_s24, %s3324_s6  }
   0xf   :  { %s48_s26 = sshll.u32 %s3325_s25, 4  ;;  %s3326_s2 = smov 192   ;;  %s49_s26 = int_to_ptr.vmem [resolvable:$true] %s48_s26 }
  0x10   :  { %s3327_s27 = smov 12   ;;  %s84_s28 = sshll.u32 %s3938_s14, 4  ;;  %s85_s28 = int_to_ptr.hbm [resolvable:$true] %s84_s28 }
  0x11   :  { %s46_s5 = sshll.u32 %s3958_s1, 4  ;;  %s3328_s30 = smov [#allocation7]   ;;  %s47_s5 = int_to_ptr.hbm [resolvable:$true] %s46_s5 }
  0x12   :  { %54 = dma.hbm_to_vmem [thread:$0]  %s47_s5, 6144, %s49_s26, [#allocation3], %s3326_s2, %s3326_s2, %s3327_s27  }
  0x13   :  { %s86_s22 = sshll.u32 %s3328_s30, 4  ;;  %s3329_s0 = smov 64   ;;  %s87_s22 = int_to_ptr.vmem [resolvable:$true] %s86_s22 }
  0x14   :  { %s3330_s23 = smov 4  }
  0x15   :  { %92 = dma.hbm_to_vmem [thread:$0]  %s85_s28, 4096, %s87_s22, [#allocation6], %s3329_s0, %s3329_s0, %s3330_s23  }
  0x16   :  { %3316 = dma.done.wait [#allocation3], 6144  }
  0x17   :  { %3317 = vsyncadd [#allocation3], 4294961152 }
  0x18   :  { %3318 = dma.done.wait [#allocation6], 8192  }
  0x19   :  { %3319 = vsyncadd [#allocation6], 4294959104  ;;  %s3959_s1 = sld [smem:[#allocation12_spill]]  ;;  %v3331_v2 = vmov 128.0   ;;  %v2403_v17 = vld [vmem:[#allocation2 + $0xa8] sm:$0xf] }
  0x1a   :  { %3098 = vrcp.f32 %v3331_v2  ;;  %v2948_v18 = vld [vmem:[#allocation2 + $0xb0] sm:$0xf0]  ;;  %v2947_v19 = vld [vmem:[#allocation2 + $0xac] sm:$0xf]  ;;  %v2405_v21 = vld [vmem:[#allocation2 + $0xb4] sm:$0xf0] }
  0x1b   :  { %v2404_v20 = vor.u32 %v2948_v18, %v2403_v17  ;;  %v2411_v22 = vld [vmem:[#allocation2 + $0xb0] sm:$0xf]  ;;  %v2949_v23 = vld [vmem:[#allocation2 + $0xb8] sm:$0xf0]  ;;  %v2408_v24 = vor.u32 %v2947_v19, %v2405_v21  ;;  %v2944_v28 = vld [vmem:[#allocation2 + $0x94] sm:$0xf] }
  0x1c   :  { %v2412_v25 = vor.u32 %v2949_v23, %v2411_v22  ;;  %v2391_v26 = vld [vmem:[#allocation2 + $0x90] sm:$0xf]  ;;  %v2945_v27 = vld [vmem:[#allocation2 + $0x98] sm:$0xf0]  ;;  %v2393_v30 = vld [vmem:[#allocation2 + $0x9c] sm:$0xf0] }
  0x1d   :  { %366 = vmatpush.bf16.msra.mxu0 %v2404_v20  ;;  %380 = vmatpush.bf16.msra.mxu1 %v2408_v24  ;;  %v2392_v29 = vor.u32 %v2945_v27, %v2391_v26  ;;  %v2399_v31 = vld [vmem:[#allocation2 + $0x98] sm:$0xf]  ;;  %v2946_v32 = vld [vmem:[#allocation2 + $0xa0] sm:$0xf0]  ;;  %v2396_v33 = vor.u32 %v2944_v28, %v2393_v30  ;;  %v2941_v37 = vld [vmem:[#allocation2 + $0x7c] sm:$0xf] }
  0x1e   :  { %394 = vmatpush.bf16.msra.mxu2 %v2412_v25  ;;  %v2400_v34 = vor.u32 %v2946_v32, %v2399_v31  ;;  %v2379_v35 = vld [vmem:[#allocation2 + $0x78] sm:$0xf]  ;;  %v2942_v36 = vld [vmem:[#allocation2 + $0x80] sm:$0xf0]  ;;  %v2381_v39 = vld [vmem:[#allocation2 + $0x84] sm:$0xf0] }
  0x1f   :  { %v120_v0 = vld [vmem:[%s3959_s1] sm:$0xff]  ;;  %v121_v1 = vld [vmem:[%s3959_s1 + $0x8] sm:$0xff]  ;;  %v2380_v38 = vor.u32 %v2942_v36, %v2379_v35  ;;  %v2384_v42 = vor.u32 %v2941_v37, %v2381_v39  ;;  %v2369_v48 = vld [vmem:[#allocation2 + $0x6c] sm:$0xf0]  ;;  %s3960_s6 = sld [smem:[#allocation16_spill]]  ;;  %vm467_vm7 = vcmask 130048  }
  0x20   :  { %124 = vadd.xlane.f32.xlu0 %v120_v0  ;;  %v3099_v3 = vpop.eup %3098  ;;  %v2387_v40 = vld [vmem:[#allocation2 + $0x80] sm:$0xf]  ;;  %v2943_v41 = vld [vmem:[#allocation2 + $0x88] sm:$0xf0]  ;;  %v2938_v46 = vld [vmem:[#allocation2 + $0x64] sm:$0xf] }
  0x21   :  { %v129_v4 = vmul.f32 128.0, %v3099_v3  ;;  %vm133_vm0 = vweird.f32 %v3099_v3  ;;  %367 = vmatpush.bf16.msra.mxu0 %v2392_v29  ;;  %381 = vmatpush.bf16.msra.mxu1 %v2396_v33  ;;  %v2388_v43 = vor.u32 %v2943_v41, %v2387_v40  ;;  %v2367_v44 = vld [vmem:[#allocation2 + $0x60] sm:$0xf]  ;;  %v2939_v45 = vld [vmem:[#allocation2 + $0x68] sm:$0xf0]  ;;  %v2372_v51 = vor.u32 %v2938_v46, %v2369_v48  ;;  %s3961_s2 = sld [smem:[#allocation17_spill]] }
  0x22   :  { %395 = vmatpush.bf16.msra.mxu2 %v2400_v34  ;;  %v2368_v47 = vor.u32 %v2939_v45, %v2367_v44  ;;  %v2375_v49 = vld [vmem:[#allocation2 + $0x68] sm:$0xf]  ;;  %v2940_v50 = vld [vmem:[#allocation2 + $0x70] sm:$0xf0]  ;;  %v2935_v55 = vld [vmem:[#allocation2 + $0x4c] sm:$0xf] }
  0x23   :  { %v130_v5 = vsub.f32 1.0, %v129_v4  ;;  %v2376_v52 = vor.u32 %v2940_v50, %v2375_v49  ;;  %v2355_v53 = vld [vmem:[#allocation2 + $0x48] sm:$0xf]  ;;  %v2936_v54 = vld [vmem:[#allocation2 + $0x50] sm:$0xf0]  ;;  %s3962_s30 = sld [smem:[#allocation14_spill]] }
  0x24   :  { %v2356_v56 = vor.u32 %v2936_v54, %v2355_v53  ;;  %v2357_v57 = vld [vmem:[#allocation2 + $0x54] sm:$0xf0]  ;;  %v2363_v58 = vld [vmem:[#allocation2 + $0x50] sm:$0xf]  ;;  %v2937_v59 = vld [vmem:[#allocation2 + $0x58] sm:$0xf0] }
  0x25   :  { %v131_v6 = vmul.f32 %v3099_v3, %v130_v5  ;;  %368 = vmatpush.bf16.msra.mxu0 %v2380_v38  ;;  %382 = vmatpush.bf16.msra.mxu1 %v2384_v42  ;;  %v2360_v60 = vor.u32 %v2935_v55, %v2357_v57  ;;  %v2364_v61 = vor.u32 %v2937_v59, %v2363_v58  ;;  %v2343_v62 = vld [vmem:[#allocation2 + $0x30] sm:$0xf]  ;;  %v2933_v63 = vld [vmem:[#allocation2 + $0x38] sm:$0xf0]  ;;  %v2345_v2 = vld [vmem:[#allocation2 + $0x3c] sm:$0xf0] }
  0x26   :  { %396 = vmatpush.bf16.msra.mxu2 %v2388_v43  ;;  %v2934_v4 = vld [vmem:[#allocation2 + $0x40] sm:$0xf0]  ;;  %v2319_v19 = vld [vmem:[#allocation2] sm:$0xf]  ;;  %v2927_v20 = vld [vmem:[#allocation2 + $0x8] sm:$0xf0] }
  0x27   :  { %v132_v7 = vadd.f32 %v3099_v3, %v131_v6  ;;  %v2926_v21 = vld [vmem:[#allocation2 + $0x4] sm:$0xf]  ;;  %v2320_v23 = vor.u32 %v2927_v20, %v2319_v19  ;;  %v2321_v24 = vld [vmem:[#allocation2 + $0xc] sm:$0xf0]  ;;  %v2327_v25 = vld [vmem:[#allocation2 + $0x8] sm:$0xf] }
  0x28   :  { %126 = vadd.xlane.f32.xlu0 %v121_v1  ;;  %v2928_v26 = vld [vmem:[#allocation2 + $0x10] sm:$0xf0]  ;;  %v2324_v28 = vor.u32 %v2926_v21, %v2321_v24  ;;  %s3963_s28 = sld [smem:[#allocation13_spill]] }
  0x29   :  { %v3463_v8 = vsel %vm133_vm0, %v3099_v3, %v132_v7  ;;  %369 = vmatpush.bf16.msra.mxu0 %v2368_v47  ;;  %383 = vmatpush.bf16.msra.mxu1 %v2372_v51  ;;  %v2351_v3 = vld [vmem:[#allocation2 + $0x38] sm:$0xf]  ;;  %v2328_v29 = vor.u32 %v2928_v26, %v2327_v25  ;;  %v3082_v47 = vld [vmem:[%s3960_s6] ss:$0 sm:$0xff]  ;;  %s3965_s14 = sld [smem:[#allocation19_spill]] }
  0x2a   :  { %397 = vmatpush.bf16.msra.mxu2 %v2376_v52  ;;  %v2352_v6 = vor.u32 %v2934_v4, %v2351_v3  ;;  %v2331_v7 = vld [vmem:[#allocation2 + $0x18] sm:$0xf]  ;;  %v3083_v52 = vld [vmem:[%s3961_s2] ss:$0 sm:$0xff]  ;;  %v3497_v4 = vld [vmem:[%s3962_s30 + $0x8] sm:$0xff] }
  0x2d   :  { %370 = vmatpush.bf16.msra.mxu0 %v2356_v56  ;;  %384 = vmatpush.bf16.msra.mxu1 %v2360_v60 }
  0x2e   :  { %398 = vmatpush.bf16.msra.mxu2 %v2364_v61 }
  0x32   :  { %399 = vmatpush.bf16.msra.mxu2 %v2352_v6  ;;  %v3502_v6 = vld [vmem:[%s3962_s30] sm:$0xff] }
  0x93   :  { %v125_v9 = vpop.xlane.xlu0 %124 }
  0x94   :  { %v135_v10 = vmul.f32 %v3463_v8, %v125_v9  ;;  %v2930_v9 = vld [vmem:[#allocation2 + $0x20] sm:$0xf0] }
  0x96   :  { %v3466_v11 = vsub.f32 %v120_v0, %v135_v10  ;;  %v2932_v0 = vld [vmem:[#allocation2 + $0x34] sm:$0xf]  ;;  %v2929_v10 = vld [vmem:[#allocation2 + $0x1c] sm:$0xf] }
  0x97   :  { %v2348_v5 = vor.u32 %v2932_v0, %v2345_v2 }
  0x98   :  { %v139_v12 = vmul.f32 %v3466_v11, %v3466_v11 }
  0x99   :  { %385 = vmatpush.bf16.msra.mxu1 %v2348_v5 }
  0x9a   :  { %141 = vadd.xlane.f32.xlu1 %v139_v12  ;;  %v2332_v12 = vor.u32 %v2930_v9, %v2331_v7 }
  0x9b   :  { %v127_v13 = vpop.xlane.xlu0 %126 }
  0x9c   :  { %v136_v14 = vmul.f32 %v3463_v8, %v127_v13  ;;  %v2333_v13 = vld [vmem:[#allocation2 + $0x24] sm:$0xf0] }
  0x9d   :  { %v2336_v17 = vor.u32 %v2929_v10, %v2333_v13 }
  0x9e   :  { %v3471_v15 = vsub.f32 %v121_v1, %v136_v14  ;;  %v2344_v1 = vor.u32 %v2933_v63, %v2343_v62  ;;  %v2339_v14 = vld [vmem:[#allocation2 + $0x20] sm:$0xf] }
  0x9f   :  { %386 = vmatpush.bf16.msra.mxu1 %v2336_v17  ;;  %v3509_v17 = vld [vmem:[%s3962_s30 + $0x18] sm:$0xff] }
  0xa0   :  { %v140_v16 = vmul.f32 %v3471_v15, %v3471_v15  ;;  %371 = vmatpush.bf16.msra.mxu0 %v2344_v1 }
  0xa2   :  { %143 = vadd.xlane.f32.xlu1 %v140_v16  ;;  %v2931_v16 = vld [vmem:[#allocation2 + $0x28] sm:$0xf0] }
  0xa3   :  { %v2340_v18 = vor.u32 %v2931_v16, %v2339_v14  ;;  %387 = vmatpush.bf16.msra.mxu1 %v2324_v28  ;;  %v3538_v28 = vld [vmem:[%s3962_s30 + $0x30] sm:$0xff] }
  0xa4   :  { %372 = vmatpush.bf16.msra.mxu0 %v2332_v12 }
  0xa5   :  { %400 = vmatpush.bf16.msra.mxu2 %v2340_v18  ;;  %v3514_v18 = vld [vmem:[%s3962_s30 + $0x10] sm:$0xff] }
  0xa8   :  { %373 = vmatpush.bf16.msra.mxu0 %v2320_v23  ;;  %v3526_v23 = vld [vmem:[%s3962_s30 + $0x20] sm:$0xff] }
  0xa9   :  { %401 = vmatpush.bf16.msra.mxu2 %v2328_v29 }
 0x10d   :  { %v142_v22 = vpop.xlane.xlu1 %141 }
 0x10e   :  { %v145_v27 = vmul.f32 %v142_v22, %v3463_v8  ;;  %v3521_v22 = vld [vmem:[%s3962_s30 + $0x28] sm:$0xff] }
 0x110   :  { %v147_v30 = vadd.f32 1e-12, %v145_v27  ;;  %v3533_v27 = vld [vmem:[%s3962_s30 + $0x38] sm:$0xff] }
 0x112   :  { %3100 = vrsqrt.f32 %v147_v30  ;;  %vm155_vm2 = vweird.f32 %v147_v30 }
 0x115   :  { %v144_v31 = vpop.xlane.xlu1 %143 }
 0x116   :  { %v146_v32 = vmul.f32 %v144_v31, %v3463_v8 }
 0x118   :  { %v3101_v33 = vpop.eup %3100  ;;  %v148_v34 = vadd.f32 1e-12, %v146_v32 }
 0x119   :  { %v150_v35 = vmul.f32 %v3101_v33, %v147_v30  ;;  %vm156_vm1 = vweird.f32 %v3101_v33 }
 0x11a   :  { %3102 = vrsqrt.f32 %v148_v34  ;;  %vm157_vm3 = vmor %vm155_vm2, %vm156_vm1  ;;  %vm165_vm5 = vweird.f32 %v148_v34 }
 0x11b   :  { %v151_v36 = vmul.f32 %v3101_v33, %v150_v35 }
 0x11d   :  { %v152_v37 = vmul.f32 0.5, %v151_v36 }
 0x11f   :  { %v153_v38 = vsub.f32 1.5, %v152_v37 }
 0x120   :  { %v3103_v39 = vpop.eup %3102 }
 0x121   :  { %v154_v40 = vmul.f32 %v3101_v33, %v153_v38  ;;  %v160_v41 = vmul.f32 %v3103_v39, %v148_v34  ;;  %vm166_vm4 = vweird.f32 %v3103_v39  ;;  %v182_v38 = vld [vmem:[%s3963_s28 + $0x8] sm:$0xff] }
 0x122   :  { %vm167_vm6 = vmor %vm165_vm5, %vm166_vm4 }
 0x123   :  { %v161_v42 = vmul.f32 %v3103_v39, %v160_v41  ;;  %v158_v43 = vsel %vm157_vm3, %v3101_v33, %v154_v40  ;;  %v181_v33 = vld [vmem:[%s3963_s28] sm:$0xff] }
 0x124   :  { %v169_v46 = vmul.f32 %v158_v43, %v3466_v11  ;;  %v183_v43 = vld [vmem:[%s3963_s28 + $0x10] sm:$0xff] }
 0x125   :  { %v162_v44 = vmul.f32 0.5, %v161_v42 }
 0x126   :  { %v174_v51 = vmul.f32 %v3082_v47, %v169_v46 }
 0x127   :  { %v163_v45 = vsub.f32 1.5, %v162_v44 }
 0x128   :  { %v3485_v54 = vadd.f32 %v3083_v52, %v174_v51 }
 0x129   :  { %v164_v48 = vmul.f32 %v3103_v39, %v163_v45 }
 0x12b   :  { %v168_v49 = vsel %vm167_vm6, %v3103_v39, %v164_v48 }
 0x12c   :  { %v170_v50 = vmul.f32 %v168_v49, %v3471_v15  ;;  %v230_v15 = vld [vmem:[%s3931_s7] sm:$0x7] }
 0x12d   :  { %v233_v58 = vperm.slane %v230_v15, 1  ;;  %v232_v62 = vperm.slane %v230_v15, 0  ;;  %v234_v3 = vperm.slane %v230_v15, 2  ;;  %v185_v49 = vld [vmem:[%s3963_s28 + $0x20] sm:$0xff] }
 0x12e   :  { %v175_v53 = vmul.f32 %v3082_v47, %v170_v50 }
 0x130   :  { %v3487_v55 = vadd.f32 %v3083_v52, %v175_v53 }
 0x132   :  { %v229_v11 = vpack.c.bf16 %v3487_v55, %v3485_v54 }
 0x134   :  { %374 = vmatmul.bf16.vlgmr.msra.gmra.mxu0 %v229_v11  ;;  %388 = vmatmul.bf16.vlgmr.msra.gmra.mxu1 %v229_v11 }
 0x135   :  { %402 = vmatmul.bf16.vlgmr.msra.gmra.mxu2 %v229_v11  ;;  %v186_v11 = vld [vmem:[%s3963_s28 + $0x28] sm:$0xff] }
 0x1b1   :  { %v375_v56 = vpop.f32.mrf.mxu0  ;;  %v389_v57 = vpop.f32.mrf.mxu1 }
 0x1b2   :  { %v390_v63 = vadd.f32 %v389_v57, %v233_v58  ;;  %v376_v5 = vadd.f32 %v375_v56, %v232_v62 }
 0x1b4   :  { %v410_v13 = vmul.f32 %v376_v5, %v3502_v6  ;;  %v412_v20 = vmul.f32 %v376_v5, %v3514_v18  ;;  %v414_v25 = vmul.f32 %v376_v5, %v3526_v23  ;;  %v416_v30 = vmul.f32 %v376_v5, %v3538_v28 }
 0x1b8   :  { %v403_v59 = vpop.f32.mrf.mxu2 }
 0x1b9   :  { %v377_v60 = vpop.f32.mrf.mxu0  ;;  %v391_v61 = vpop.f32.mrf.mxu1  ;;  %v404_v10 = vadd.f32 %v403_v59, %v234_v3  ;;  %v187_v59 = vld [vmem:[%s3963_s28 + $0x30] sm:$0xff] }
 0x1ba   :  { %v392_v0 = vadd.f32 %v391_v61, %v233_v58  ;;  %v378_v1 = vadd.f32 %v377_v60, %v232_v62 }
 0x1bc   :  { %v408_v2 = vpack.c.bf16 %v392_v0, %v390_v63  ;;  %v411_v9 = vmul.f32 %v378_v1, %v3497_v4  ;;  %v413_v19 = vmul.f32 %v378_v1, %v3509_v17  ;;  %v415_v24 = vmul.f32 %v378_v1, %v3521_v22  ;;  %v184_v0 = vld [vmem:[%s3963_s28 + $0x18] sm:$0xff] }
 0x1bd   :  { %v417_v29 = vmul.f32 %v378_v1, %v3533_v27 }
 0x1be   :  { %429 = vmatpush.bf16.xpose.msra.mxu3 %v408_v2  ;;  %v418_v16 = vpack.c.bf16 %v411_v9, %v410_v13  ;;  %v419_v21 = vpack.c.bf16 %v413_v19, %v412_v20  ;;  %v420_v26 = vpack.c.bf16 %v415_v24, %v414_v25  ;;  %v188_v2 = vld [vmem:[%s3963_s28 + $0x38] sm:$0xff] }
 0x1bf   :  { %v421_v31 = vpack.c.bf16 %v417_v29, %v416_v30 }
 0x1c0   :  { %v405_v7 = vpop.f32.mrf.mxu2 }
 0x1c1   :  { %v406_v12 = vadd.f32 %v405_v7, %v234_v3 }
 0x1c3   :  { %v409_v14 = vpack.c.bf16 %v406_v12, %v404_v10 }
 0x1c5   :  { %579 = vmatpush.bf16.msrb.mxu0 %v409_v14  ;;  %3070 = vmatpush.bf16.msrb.mxu2 %v409_v14 }
 0x1c6   :  { %430 = vmatmul.bf16.vlgmr.msra.gmra.mxu3 %v418_v16 }
 0x1d6   :  { %435 = vmatmul.bf16.gmra.mxu3 %v419_v21 }
 0x1e6   :  { %440 = vmatmul.bf16.gmra.mxu3 %v420_v26 }
 0x1f6   :  { %445 = vmatmul.bf16.gmra.mxu3 %v421_v31 }
 0x249   :  { %v431_v32 = vpop.f32.mrf.mxu3 }
 0x24a   :  { %v451_v34 = vmul.f32 0.17677669, %v431_v32 }
 0x24c   :  { %v459_v35 = vadd.f32 %v451_v34, %v181_v33 }
 0x24e   :  { %v468_v36 = vsel %vm467_vm7, %v459_v35, -inf }
 0x24f   :  { %469 = vmax.xlane.f32.xlu0 %v468_v36 }
 0x251   :  { %v433_v37 = vpop.f32.mrf.mxu3 }
 0x252   :  { %v452_v39 = vmul.f32 0.17677669, %v433_v37 }
 0x254   :  { %v460_v40 = vadd.f32 %v452_v39, %v182_v38 }
 0x256   :  { %v471_v41 = vsel %vm467_vm7, %v460_v40, -inf }
 0x257   :  { %472 = vmax.xlane.f32.xlu1 %v471_v41 }
 0x259   :  { %v436_v42 = vpop.f32.mrf.mxu3 }
 0x25a   :  { %v453_v44 = vmul.f32 0.17677669, %v436_v42 }
 0x25c   :  { %v461_v45 = vadd.f32 %v453_v44, %v183_v43 }
 0x25e   :  { %v474_v46 = vsel %vm467_vm7, %v461_v45, -inf }
 0x25f   :  { %475 = vmax.xlane.f32.xlu1 %v474_v46 }
 0x261   :  { %v438_v47 = vpop.f32.mrf.mxu3 }
 0x262   :  { %v454_v62 = vmul.f32 0.17677669, %v438_v47 }
 0x264   :  { %v462_v5 = vadd.f32 %v454_v62, %v184_v0 }
 0x266   :  { %v477_v9 = vsel %vm467_vm7, %v462_v5, -inf }
 0x269   :  { %v441_v48 = vpop.f32.mrf.mxu3 }
 0x26a   :  { %v455_v50 = vmul.f32 0.17677669, %v441_v48 }
 0x26c   :  { %v463_v51 = vadd.f32 %v455_v50, %v185_v49 }
 0x26e   :  { %v480_v52 = vsel %vm467_vm7, %v463_v51, -inf }
 0x26f   :  { %481 = vmax.xlane.f32.xlu2 %v480_v52 }
 0x271   :  { %v443_v53 = vpop.f32.mrf.mxu3 }
 0x272   :  { %v456_v56 = vmul.f32 0.17677669, %v443_v53 }
 0x274   :  { %v464_v57 = vadd.f32 %v456_v56, %v186_v11 }
 0x276   :  { %v483_v15 = vsel %vm467_vm7, %v464_v57, -inf }
 0x277   :  { %484 = vmax.xlane.f32.xlu2 %v483_v15 }
 0x279   :  { %v446_v58 = vpop.f32.mrf.mxu3 }
 0x27a   :  { %v457_v60 = vmul.f32 0.17677669, %v446_v58 }
 0x27c   :  { %v465_v61 = vadd.f32 %v457_v60, %v187_v59 }
 0x27e   :  { %v486_v63 = vsel %vm467_vm7, %v465_v61, -inf }
 0x27f   :  { %487 = vmax.xlane.f32.xlu2 %v486_v63 }
 0x281   :  { %v448_v1 = vpop.f32.mrf.mxu3 }
 0x282   :  { %v458_v3 = vmul.f32 0.17677669, %v448_v1 }
 0x284   :  { %v466_v7 = vadd.f32 %v458_v3, %v188_v2 }
 0x286   :  { %v489_v10 = vsel %vm467_vm7, %v466_v7, -inf }
 0x287   :  { %478 = vmax.xlane.f32.xlu2 %v477_v9  ;;  %490 = vmax.xlane.f32.xlu0 %v489_v10 }
 0x2c2   :  { %v470_v12 = vpop.xlane.xlu0 %469 }
 0x2c3   :  { %v492_v13 = vsub.f32 %v459_v35, %v470_v12 }
 0x2c5   :  { %v500_v14 = vmul.f32 1.442695, %v492_v13 }
 0x2c7   :  { %3104 = vpow2.f32 %v500_v14 }
 0x2ca   :  { %v473_v20 = vpop.xlane.xlu1 %472 }
 0x2cb   :  { %v493_v25 = vsub.f32 %v460_v40, %v473_v20 }
 0x2cd   :  { %v3574_v16 = vpop.eup %3104  ;;  %v502_v29 = vmul.f32 1.442695, %v493_v25 }
 0x2ce   :  { %v516_v19 = vsel %vm467_vm7, %v3574_v16, 0.0 }
 0x2cf   :  { %517 = vadd.xlane.f32.xlu2 %v516_v19 }
 0x2d2   :  { %v476_v30 = vpop.xlane.xlu1 %475 }
 0x2d3   :  { %v494_v34 = vsub.f32 %v461_v45, %v476_v30 }
 0x2d5   :  { %v504_v37 = vmul.f32 1.442695, %v494_v34  ;;  %v2957_v34 = vld [vmem:[%s3932_s8 + $0x38] sm:$0xff] }
 0x2d6   :  { %684 = vmatpush.bf16.msrb.mxu1 %v2957_v34 }
 0x2e2   :  { %v482_v21 = vpop.xlane.xlu2 %481 }
 0x2e3   :  { %v496_v24 = vsub.f32 %v463_v51, %v482_v21 }
 0x2e5   :  { %v508_v26 = vmul.f32 1.442695, %v496_v24 }
 0x2e7   :  { %3106 = vpow2.f32 %v508_v26 }
 0x2e8   :  { %3108 = vpow2.f32 %v502_v29 }
 0x2ea   :  { %v485_v31 = vpop.xlane.xlu2 %484 }
 0x2eb   :  { %v497_v32 = vsub.f32 %v464_v57, %v485_v31 }
 0x2ed   :  { %v3107_v33 = vpop.eup %3106  ;;  %v510_v35 = vmul.f32 1.442695, %v497_v32 }
 0x2ee   :  { %v528_v36 = vsel %vm467_vm7, %v3107_v33, 0.0  ;;  %v3109_v39 = vpop.eup %3108 }
 0x2ef   :  { %3110 = vpow2.f32 %v510_v35  ;;  %529 = vadd.xlane.f32.xlu0 %v528_v36  ;;  %v519_v44 = vsel %vm467_vm7, %v3109_v39, 0.0  ;;  %v2956_v35 = vld [vmem:[%s3932_s8 + $0x30] sm:$0xff]  ;;  %v2955_v36 = vld [vmem:[%s3932_s8 + $0x28] sm:$0xff] }
 0x2f0   :  { %3112 = vpow2.f32 %v504_v37  ;;  %685 = vmatpush.bf16.msrb.mxu1 %v2956_v35  ;;  %v2954_v37 = vld [vmem:[%s3932_s8 + $0x20] sm:$0xff] }
 0x2f1   :  { %v2966_v35 = vld [vmem:[#allocation5 + $0x44] sm:$0xf] }
 0x2f2   :  { %v488_v38 = vpop.xlane.xlu2 %487 }
 0x2f3   :  { %v498_v41 = vsub.f32 %v465_v61, %v488_v38  ;;  %v2953_v38 = vld [vmem:[%s3932_s8 + $0x18] sm:$0xff] }
 0x2f4   :  { %686 = vmatpush.bf16.msrb.mxu1 %v2955_v36  ;;  %v2485_v36 = vld [vmem:[#allocation5 + $0x48] sm:$0xf0] }
 0x2f5   :  { %v3111_v42 = vpop.eup %3110  ;;  %v512_v40 = vmul.f32 1.442695, %v498_v41  ;;  %v2951_v41 = vld [vmem:[%s3932_s8 + $0x8] sm:$0xff] }
 0x2f6   :  { %v531_v43 = vsel %vm467_vm7, %v3111_v42, 0.0  ;;  %v3113_v47 = vpop.eup %3112 }
 0x2f7   :  { %3114 = vpow2.f32 %v512_v40  ;;  %532 = vadd.xlane.f32.xlu1 %v531_v43  ;;  %520 = vadd.xlane.f32.xlu0 %v519_v44  ;;  %v522_v11 = vsel %vm467_vm7, %v3113_v47, 0.0  ;;  %v2950_v40 = vld [vmem:[%s3932_s8] sm:$0xff] }
 0x2f8   :  { %687 = vmatpush.bf16.msrb.mxu1 %v2954_v37  ;;  %v2483_v37 = vld [vmem:[#allocation5 + $0x40] sm:$0xf] }
 0x2fa   :  { %v479_v45 = vpop.xlane.xlu2 %478  ;;  %v491_v46 = vpop.xlane.xlu0 %490 }
 0x2fb   :  { %v495_v48 = vsub.f32 %v462_v5, %v479_v45  ;;  %v499_v49 = vsub.f32 %v466_v7, %v491_v46 }
 0x2fc   :  { %688 = vmatpush.bf16.msrb.mxu1 %v2953_v38  ;;  %v2488_v38 = vor.u32 %v2966_v35, %v2485_v36  ;;  %v2979_v35 = vld [vmem:[#allocation7 + $0x28] sm:$0xff] }
 0x2fd   :  { %v3115_v50 = vpop.eup %3114  ;;  %v506_v51 = vmul.f32 1.442695, %v495_v48  ;;  %v514_v52 = vmul.f32 1.442695, %v499_v49  ;;  %v2987_v36 = vld [vmem:[#allocation7 + $0x68] sm:$0xff] }
 0x2fe   :  { %v534_v53 = vsel %vm467_vm7, %v3115_v50, 0.0 }
 0x2ff   :  { %3116 = vpow2.f32 %v506_v51  ;;  %535 = vadd.xlane.f32.xlu1 %v534_v53  ;;  %523 = vadd.xlane.f32.xlu0 %v522_v11 }
 0x300   :  { %3118 = vpow2.f32 %v514_v52 }
 0x305   :  { %v3117_v56 = vpop.eup %3116 }
 0x306   :  { %v3119_v57 = vpop.eup %3118  ;;  %v525_v15 = vsel %vm467_vm7, %v3117_v56, 0.0 }
 0x307   :  { %526 = vadd.xlane.f32.xlu1 %v525_v15  ;;  %v537_v58 = vsel %vm467_vm7, %v3119_v57, 0.0 }
 0x308   :  { %538 = vadd.xlane.f32.xlu2 %v537_v58 }
 0x342   :  { %v518_v60 = vpop.xlane.xlu2 %517 }
 0x362   :  { %v530_v59 = vpop.xlane.xlu0 %529 }
 0x363   :  { %3120 = vrcp.f32 %v530_v59 }
 0x364   :  { %3122 = vrcp.f32 %v518_v60 }
 0x369   :  { %v3121_v63 = vpop.eup %3120 }
 0x36a   :  { %v533_v61 = vpop.xlane.xlu1 %532  ;;  %v521_v62 = vpop.xlane.xlu0 %520  ;;  %v552_v3 = vmul.f32 %v3121_v63, %v3107_v33 }
 0x36b   :  { %3124 = vrcp.f32 %v533_v61  ;;  %v3123_v0 = vpop.eup %3122 }
 0x36c   :  { %3126 = vrcp.f32 %v521_v62  ;;  %v548_v9 = vmul.f32 %v3123_v0, %v3574_v16 }
 0x371   :  { %v3125_v1 = vpop.eup %3124 }
 0x372   :  { %v3127_v2 = vpop.eup %3126  ;;  %v553_v5 = vmul.f32 %v3125_v1, %v3111_v42  ;;  %v536_v7 = vpop.xlane.xlu1 %535  ;;  %v2509_v1 = vld [vmem:[#allocation5 + $0x78] sm:$0xf0] }
 0x373   :  { %v549_v10 = vmul.f32 %v3127_v2, %v3109_v39  ;;  %v524_v14 = vpop.xlane.xlu0 %523  ;;  %v2952_v39 = vld [vmem:[%s3932_s8 + $0x10] sm:$0xff]  ;;  %v2970_v2 = vld [vmem:[#allocation5 + $0x64] sm:$0xf] }
 0x374   :  { %v558_v12 = vpack.c.bf16 %v553_v5, %v552_v3  ;;  %3128 = vrcp.f32 %v524_v14  ;;  %689 = vmatpush.bf16.msrb.mxu1 %v2952_v39  ;;  %v2501_v5 = vld [vmem:[#allocation5 + $0x68] sm:$0xf0]  ;;  %v2967_v39 = vld [vmem:[#allocation5 + $0x44] sm:$0xf0] }
 0x375   :  { %v556_v13 = vpack.c.bf16 %v549_v10, %v548_v9  ;;  %3130 = vrcp.f32 %v536_v7  ;;  %v2504_v7 = vor.u32 %v2970_v2, %v2501_v5 }
 0x376   :  { %2415 = vmatmul.msk.bf16.vlgmr.msrb.gmra.mxu2 %vm467_vm7, %v558_v12 }
 0x377   :  { %2413 = vmatmul.msk.bf16.vlgmr.msrb.gmra.mxu0 %vm467_vm7, %v556_v13 }
 0x378   :  { %690 = vmatpush.bf16.msrb.mxu1 %v2951_v41  ;;  %v2484_v41 = vor.u32 %v2967_v39, %v2483_v37  ;;  %v2978_v37 = vld [vmem:[#allocation7 + $0x20] sm:$0xff]  ;;  %v2977_v39 = vld [vmem:[#allocation7 + $0x18] sm:$0xff] }
 0x37a   :  { %v527_v19 = vpop.xlane.xlu1 %526  ;;  %v3129_v21 = vpop.eup %3128 }
 0x37b   :  { %3132 = vrcp.f32 %v527_v19  ;;  %v539_v20 = vpop.xlane.xlu2 %538  ;;  %v3131_v24 = vpop.eup %3130  ;;  %v550_v29 = vmul.f32 %v3129_v21, %v3113_v47  ;;  %v2973_v21 = vld [vmem:[#allocation5 + $0x74] sm:$0xf0] }
 0x37c   :  { %3134 = vrcp.f32 %v539_v20  ;;  %v554_v30 = vmul.f32 %v3131_v24, %v3115_v50  ;;  %691 = vmatpush.bf16.msrb.mxu1 %v2950_v40  ;;  %v2507_v20 = vld [vmem:[#allocation5 + $0x70] sm:$0xf]  ;;  %v2477_v40 = vld [vmem:[#allocation5 + $0x38] sm:$0xf0] }
 0x37d   :  { %v2508_v24 = vor.u32 %v2973_v21, %v2507_v20  ;;  %v3085_v20 = vld [vmem:[%s3934_s10] ss:$0 sm:$0xff] }
 0x37f   :  { %855 = vmatpush.bf16.msra.mxu2 %v2508_v24 }
 0x381   :  { %v3133_v25 = vpop.eup %3132 }
 0x382   :  { %v3135_v26 = vpop.eup %3134  ;;  %v551_v16 = vmul.f32 %v3133_v25, %v3117_v56  ;;  %v2499_v25 = vld [vmem:[#allocation5 + $0x60] sm:$0xf] }
 0x383   :  { %v555_v31 = vmul.f32 %v3135_v26, %v3119_v57  ;;  %v2971_v26 = vld [vmem:[#allocation5 + $0x64] sm:$0xf0] }
 0x384   :  { %v557_v32 = vpack.c.bf16 %v551_v16, %v550_v29  ;;  %v2500_v29 = vor.u32 %v2971_v26, %v2499_v25  ;;  %v2968_v16 = vld [vmem:[#allocation5 + $0x54] sm:$0xf] }
 0x385   :  { %v559_v33 = vpack.c.bf16 %v555_v31, %v554_v30  ;;  %v2493_v30 = vld [vmem:[#allocation5 + $0x58] sm:$0xf0]  ;;  %v2491_v31 = vld [vmem:[#allocation5 + $0x50] sm:$0xf] }
 0x386   :  { %856 = vmatpush.bf16.msra.mxu2 %v2500_v29  ;;  %v3086_v29 = vld [vmem:[%s3935_s11] ss:$0 sm:$0xff] }
 0x387   :  { %2414 = vmatmul.msk.bf16.gmra.mxu0 %vm467_vm7, %v557_v32  ;;  %2416 = vmatmul.msk.bf16.gmra.mxu2 %vm467_vm7, %v559_v33  ;;  %v2496_v32 = vor.u32 %v2968_v16, %v2493_v30  ;;  %v2969_v33 = vld [vmem:[#allocation5 + $0x54] sm:$0xf0] }
 0x388   :  { %v2492_v34 = vor.u32 %v2969_v33, %v2491_v31  ;;  %v2989_v33 = vld [vmem:[#allocation7 + $0x78] sm:$0xff] }
 0x38a   :  { %857 = vmatpush.bf16.msra.mxu2 %v2492_v34  ;;  %v2988_v34 = vld [vmem:[#allocation7 + $0x70] sm:$0xff] }
 0x38e   :  { %858 = vmatpush.bf16.msra.mxu2 %v2484_v41  ;;  %v2985_v41 = vld [vmem:[#allocation7 + $0x58] sm:$0xff] }
 0x3f4   :  { %v581_v42 = vpop.f32.mrf.mxu0 }
 0x3f5   :  { %v601_v50 = vmul.f32 %v581_v42, %v3502_v6  ;;  %v2964_v42 = vld [vmem:[#allocation5 + $0x34] sm:$0xf] }
 0x3f9   :  { %v591_v43 = vpop.f32.mrf.mxu2 }
 0x3fa   :  { %v605_v56 = vmul.f32 %v591_v43, %v3526_v23  ;;  %v2475_v43 = vld [vmem:[#allocation5 + $0x30] sm:$0xf] }
 0x3fc   :  { %v583_v44 = vpop.f32.mrf.mxu0 }
 0x3fd   :  { %v602_v51 = vmul.f32 %v583_v44, %v3497_v4  ;;  %v3084_v4 = vld [vmem:[%s3933_s9] ss:$0 sm:$0xff]  ;;  %v2480_v44 = vor.u32 %v2964_v42, %v2477_v40  ;;  %v2976_v42 = vld [vmem:[#allocation7 + $0x10] sm:$0xff] }
 0x3fe   :  { %v2984_v40 = vld [vmem:[#allocation7 + $0x50] sm:$0xff] }
 0x401   :  { %v593_v45 = vpop.f32.mrf.mxu2 }
 0x402   :  { %v606_v57 = vmul.f32 %v593_v45, %v3521_v22  ;;  %v2965_v45 = vld [vmem:[#allocation5 + $0x34] sm:$0xf0] }
 0x404   :  { %v586_v46 = vpop.f32.mrf.mxu0 }
 0x405   :  { %v603_v48 = vmul.f32 %v586_v46, %v3514_v18  ;;  %v2476_v46 = vor.u32 %v2965_v45, %v2475_v43  ;;  %v2975_v43 = vld [vmem:[#allocation7 + $0x8] sm:$0xff]  ;;  %v769_v45 = vld [vmem:[%s3937_s13] sm:$0x3] }
 0x407   :  { %v609_v53 = vadd.f32 %v603_v48, %v601_v50  ;;  %859 = vmatpush.bf16.msra.mxu2 %v2476_v46  ;;  %v2963_v48 = vld [vmem:[#allocation5 + $0x24] sm:$0xf0]  ;;  %v2974_v46 = vld [vmem:[#allocation7] sm:$0xff] }
 0x409   :  { %v611_v59 = vadd.f32 %v609_v53, %v605_v56  ;;  %v2459_v53 = vld [vmem:[#allocation5 + $0x10] sm:$0xf]  ;;  %v2960_v56 = vld [vmem:[#allocation5 + $0x14] sm:$0xf] }
 0x40a   :  { %v596_v47 = vpop.f32.mrf.mxu2 }
 0x40b   :  { %v607_v15 = vmul.f32 %v596_v47, %v3538_v28  ;;  %v2467_v47 = vld [vmem:[#allocation5 + $0x20] sm:$0xf] }
 0x40c   :  { %v588_v49 = vpop.f32.mrf.mxu0  ;;  %v2468_v50 = vor.u32 %v2963_v48, %v2467_v47  ;;  %v2982_v47 = vld [vmem:[#allocation7 + $0x40] sm:$0xff]  ;;  %v771_v48 = vperm.slane %v769_v45, 0 }
 0x40d   :  { %v604_v52 = vmul.f32 %v588_v49, %v3509_v17  ;;  %v613_v61 = vadd.f32 %v611_v59, %v607_v15  ;;  %v2962_v49 = vld [vmem:[#allocation5 + $0x24] sm:$0xf]  ;;  %v2461_v15 = vld [vmem:[#allocation5 + $0x18] sm:$0xf0]  ;;  %v2451_v59 = vld [vmem:[#allocation5] sm:$0xf] }
 0x40e   :  { %860 = vmatpush.bf16.msra.mxu2 %v2468_v50 }
 0x40f   :  { %v610_v11 = vadd.f32 %v604_v52, %v602_v51  ;;  %v2469_v51 = vld [vmem:[#allocation5 + $0x28] sm:$0xf0] }
 0x410   :  { %v2472_v52 = vor.u32 %v2962_v49, %v2469_v51  ;;  %v772_v49 = vperm.slane %v769_v45, 1 }
 0x411   :  { %v612_v18 = vadd.f32 %v610_v11, %v606_v57  ;;  %v2961_v11 = vld [vmem:[#allocation5 + $0x14] sm:$0xf0] }
 0x412   :  { %v598_v58 = vpop.f32.mrf.mxu2  ;;  %v2460_v57 = vor.u32 %v2961_v11, %v2459_v53 }
 0x413   :  { %v608_v60 = vmul.f32 %v598_v58, %v3533_v27  ;;  %v2972_v27 = vld [vmem:[#allocation5 + $0x74] sm:$0xf]  ;;  %v2464_v58 = vor.u32 %v2960_v56, %v2461_v15 }
 0x414   :  { %v2512_v3 = vor.u32 %v2972_v27, %v2509_v1  ;;  %861 = vmatpush.bf16.msra.mxu2 %v2460_v57 }
 0x415   :  { %v614_v62 = vadd.f32 %v612_v18, %v608_v60  ;;  %v2959_v60 = vld [vmem:[#allocation5 + $0x4] sm:$0xf0]  ;;  %v2958_v18 = vld [vmem:[#allocation5 + $0x4] sm:$0xf] }
 0x416   :  { %869 = vmatpush.bf16.msrb.mxu3 %v2512_v3 }
 0x417   :  { %v631_v6 = vpack.c.bf16 %v614_v62, %v613_v61  ;;  %v2453_v62 = vld [vmem:[#allocation5 + $0x8] sm:$0xf0] }
 0x419   :  { %692 = vmatmul.bf16.vlgmr.msrb.gmra.mxu1 %v631_v6 }
 0x41a   :  { %870 = vmatpush.bf16.msrb.mxu3 %v2504_v7 }
 0x41e   :  { %871 = vmatpush.bf16.msrb.mxu3 %v2496_v32  ;;  %v2981_v32 = vld [vmem:[#allocation7 + $0x38] sm:$0xff] }
 0x41f   :  { %1053 = vmatpush.bf16.msra.mxu1 %v2981_v32 }
 0x422   :  { %872 = vmatpush.bf16.msrb.mxu3 %v2488_v38  ;;  %v2986_v38 = vld [vmem:[#allocation7 + $0x60] sm:$0xff] }
 0x426   :  { %873 = vmatpush.bf16.msrb.mxu3 %v2480_v44  ;;  %v2983_v44 = vld [vmem:[#allocation7 + $0x48] sm:$0xff] }
 0x42a   :  { %874 = vmatpush.bf16.msrb.mxu3 %v2472_v52 }
 0x42e   :  { %875 = vmatpush.bf16.msrb.mxu3 %v2464_v58 }
 0x496   :  { %v693_v17 = vpop.f32.mrf.mxu1 }
 0x497   :  { %v694_v63 = vadd.f32 %v3084_v4, %v693_v17  ;;  %v2456_v17 = vor.u32 %v2958_v18, %v2453_v62 }
 0x499   :  { %v698_v23 = vadd.f32 %v694_v63, %v3485_v54  ;;  %876 = vmatpush.bf16.msrb.mxu3 %v2456_v17 }
 0x49b   :  { %702 = vadd.xlane.f32.xlu2 %v698_v23 }
 0x49e   :  { %v695_v22 = vpop.f32.mrf.mxu1 }
 0x49f   :  { %v696_v28 = vadd.f32 %v3084_v4, %v695_v22  ;;  %v2452_v4 = vor.u32 %v2959_v60, %v2451_v59 }
 0x4a1   :  { %v699_v0 = vadd.f32 %v696_v28, %v3487_v55  ;;  %862 = vmatpush.bf16.msra.mxu2 %v2452_v4 }
 0x4a3   :  { %704 = vadd.xlane.f32.xlu0 %v699_v0 }
 0x4a5   :  { %1067 = vmatpush.bf16.msrb.mxu2 %v2989_v33 }
 0x4a9   :  { %1068 = vmatpush.bf16.msrb.mxu2 %v2988_v34 }
 0x4ad   :  { %1069 = vmatpush.bf16.msrb.mxu2 %v2987_v36  ;;  %v3087_v36 = vld [vmem:[%s3939_s15] ss:$0 sm:$0xff] }
 0x4b1   :  { %1070 = vmatpush.bf16.msrb.mxu2 %v2986_v38 }
 0x4b5   :  { %1071 = vmatpush.bf16.msrb.mxu2 %v2985_v41 }
 0x4b9   :  { %1072 = vmatpush.bf16.msrb.mxu2 %v2984_v40 }
 0x4bd   :  { %1073 = vmatpush.bf16.msrb.mxu2 %v2983_v44 }
 0x4c1   :  { %1074 = vmatpush.bf16.msrb.mxu2 %v2982_v47 }
 0x50e   :  { %v703_v9 = vpop.xlane.xlu2 %702 }
 0x50f   :  { %v706_v10 = vmul.f32 %v703_v9, %v3463_v8 }
 0x511   :  { %v3628_v12 = vsub.f32 %v698_v23, %v706_v10 }
 0x513   :  { %v710_v54 = vmul.f32 %v3628_v12, %v3628_v12 }
 0x515   :  { %712 = vadd.xlane.f32.xlu1 %v710_v54 }
 0x516   :  { %v705_v13 = vpop.xlane.xlu0 %704 }
 0x517   :  { %v707_v55 = vmul.f32 %v705_v13, %v3463_v8 }
 0x519   :  { %v3633_v14 = vsub.f32 %v699_v0, %v707_v55 }
 0x51b   :  { %v711_v19 = vmul.f32 %v3633_v14, %v3633_v14 }
 0x51d   :  { %714 = vadd.xlane.f32.xlu2 %v711_v19 }
 0x588   :  { %v713_v61 = vpop.xlane.xlu1 %712 }
 0x589   :  { %v716_v6 = vmul.f32 %v713_v61, %v3463_v8 }
 0x58b   :  { %v718_v63 = vadd.f32 1e-12, %v716_v6 }
 0x58d   :  { %3136 = vrsqrt.f32 %v718_v63  ;;  %vm726_vm9 = vweird.f32 %v718_v63 }
 0x590   :  { %v715_v23 = vpop.xlane.xlu2 %714 }
 0x591   :  { %v717_v22 = vmul.f32 %v715_v23, %v3463_v8 }
 0x593   :  { %v3137_v28 = vpop.eup %3136  ;;  %v719_v0 = vadd.f32 1e-12, %v717_v22 }
 0x594   :  { %v721_v27 = vmul.f32 %v3137_v28, %v718_v63  ;;  %vm727_vm8 = vweird.f32 %v3137_v28 }
 0x595   :  { %3138 = vrsqrt.f32 %v719_v0  ;;  %vm728_vm10 = vmor %vm726_vm9, %vm727_vm8  ;;  %vm736_vm12 = vweird.f32 %v719_v0 }
 0x596   :  { %v722_v1 = vmul.f32 %v3137_v28, %v721_v27 }
 0x598   :  { %v723_v2 = vmul.f32 0.5, %v722_v1 }
 0x59a   :  { %v724_v3 = vsub.f32 1.5, %v723_v2 }
 0x59b   :  { %v3139_v5 = vpop.eup %3138 }
 0x59c   :  { %v725_v7 = vmul.f32 %v3137_v28, %v724_v3  ;;  %v731_v9 = vmul.f32 %v3139_v5, %v719_v0  ;;  %vm737_vm11 = vweird.f32 %v3139_v5 }
 0x59d   :  { %vm738_vm13 = vmor %vm736_vm12, %vm737_vm11 }
 0x59e   :  { %v732_v10 = vmul.f32 %v3139_v5, %v731_v9  ;;  %v729_v54 = vsel %vm728_vm10, %v3137_v28, %v725_v7 }
 0x59f   :  { %v740_v19 = vmul.f32 %v729_v54, %v3628_v12 }
 0x5a0   :  { %v733_v13 = vmul.f32 0.5, %v732_v10 }
 0x5a1   :  { %v745_v26 = vmul.f32 %v3085_v20, %v740_v19 }
 0x5a2   :  { %v734_v55 = vsub.f32 1.5, %v733_v13 }
 0x5a3   :  { %v3647_v30 = vadd.f32 %v3086_v29, %v745_v26 }
 0x5a4   :  { %v735_v21 = vmul.f32 %v3139_v5, %v734_v55 }
 0x5a6   :  { %v739_v24 = vsel %vm738_vm13, %v3139_v5, %v735_v21 }
 0x5a7   :  { %v741_v25 = vmul.f32 %v739_v24, %v3633_v14  ;;  %v2980_v14 = vld [vmem:[#allocation7 + $0x30] sm:$0xff] }
 0x5a8   :  { %1054 = vmatpush.bf16.msra.mxu1 %v2980_v14 }
 0x5a9   :  { %v746_v16 = vmul.f32 %v3085_v20, %v741_v25 }
 0x5ab   :  { %v3649_v31 = vadd.f32 %v3086_v29, %v746_v16 }
 0x5ac   :  { %1055 = vmatpush.bf16.msra.mxu1 %v2979_v35 }
 0x5ad   :  { %v768_v12 = vpack.c.bf16 %v3649_v31, %v3647_v30 }
 0x5af   :  { %863 = vmatmul.bf16.vlgmr.msra.gmra.mxu2 %v768_v12  ;;  %877 = vmatmul.bf16.vlgmr.msrb.gmra.mxu3 %v768_v12 }
 0x5b0   :  { %1056 = vmatpush.bf16.msra.mxu1 %v2978_v37 }
 0x5b4   :  { %1057 = vmatpush.bf16.msra.mxu1 %v2977_v39 }
 0x5b8   :  { %1058 = vmatpush.bf16.msra.mxu1 %v2976_v42 }
 0x5bc   :  { %1059 = vmatpush.bf16.msra.mxu1 %v2975_v43 }
 0x5c0   :  { %1060 = vmatpush.bf16.msra.mxu1 %v2974_v46 }
 0x632   :  { %v864_v50 = vpop.f32.mrf.mxu2  ;;  %v878_v51 = vpop.f32.mrf.mxu3 }
 0x633   :  { %v865_v52 = vadd.f32 %v864_v50, %v771_v48  ;;  %v879_v53 = vadd.f32 %v878_v51, %v772_v49 }
 0x635   :  { %v887_v11 = vmul.f32 0.044715, %v865_v52  ;;  %v888_v56 = vmul.f32 0.044715, %v879_v53  ;;  %v883_v20 = vmul.f32 0.5, %v865_v52  ;;  %v884_v25 = vmul.f32 0.5, %v879_v53 }
 0x637   :  { %v891_v57 = vmul.f32 %v887_v11, %v865_v52  ;;  %v892_v15 = vmul.f32 %v888_v56, %v879_v53  ;;  %v3011_v11 = vld [vmem:[#allocation2 + $0x16c] sm:$0xf] }
 0x639   :  { %v895_v58 = vmul.f32 %v891_v57, %v865_v52  ;;  %v896_v59 = vmul.f32 %v892_v15, %v879_v53  ;;  %v2666_v57 = vld [vmem:[#allocation2 + $0x174] sm:$0xf0]  ;;  %v2672_v15 = vld [vmem:[#allocation2 + $0x170] sm:$0xf] }
 0x63a   :  { %v866_v60 = vpop.f32.mrf.mxu2  ;;  %v880_v18 = vpop.f32.mrf.mxu3 }
 0x63b   :  { %v899_v61 = vadd.f32 %v895_v58, %v865_v52  ;;  %v867_v62 = vadd.f32 %v866_v60, %v771_v48  ;;  %v881_v6 = vadd.f32 %v880_v18, %v772_v49  ;;  %v900_v4 = vadd.f32 %v896_v59, %v879_v53  ;;  %v3012_v53 = vld [vmem:[#allocation2 + $0x170] sm:$0xf0]  ;;  %v3013_v58 = vld [vmem:[#allocation2 + $0x178] sm:$0xf0]  ;;  %v2652_v18 = vld [vmem:[#allocation2 + $0x150] sm:$0xf] }
 0x63c   :  { %v2669_v59 = vor.u32 %v3011_v11, %v2666_v57  ;;  %v2673_v60 = vor.u32 %v3013_v58, %v2672_v15  ;;  %v2580_v11 = vld [vmem:[#allocation2 + $0xc0] sm:$0xf]  ;;  %v2990_v57 = vld [vmem:[#allocation2 + $0xc4] sm:$0xf] }
 0x63d   :  { %v889_v17 = vmul.f32 0.044715, %v867_v62  ;;  %v890_v63 = vmul.f32 0.044715, %v881_v6  ;;  %v903_v23 = vmul.f32 0.7978846, %v899_v61 }
 0x63e   :  { %v904_v28 = vmul.f32 0.7978846, %v900_v4  ;;  %v885_v21 = vmul.f32 0.5, %v867_v62  ;;  %v886_v26 = vmul.f32 0.5, %v881_v6  ;;  %1320 = vmatpush.bf16.msra.mxu0 %v2669_v59  ;;  %1334 = vmatpush.bf16.msrb.mxu1 %v2673_v60  ;;  %v3009_v61 = vld [vmem:[#allocation2 + $0x158] sm:$0xf0] }
 0x63f   :  { %v893_v22 = vmul.f32 %v889_v17, %v867_v62  ;;  %v894_v0 = vmul.f32 %v890_v63, %v881_v6  ;;  %3140 = vtanh.f32 %v903_v23  ;;  %v2654_v4 = vld [vmem:[#allocation2 + $0x15c] sm:$0xf0]  ;;  %v2660_v17 = vld [vmem:[#allocation2 + $0x158] sm:$0xf]  ;;  %v3010_v63 = vld [vmem:[#allocation2 + $0x160] sm:$0xf0] }
 0x640   :  { %3142 = vtanh.f32 %v904_v28  ;;  %v2640_v28 = vld [vmem:[#allocation2 + $0x138] sm:$0xf]  ;;  %v2582_v59 = vld [vmem:[#allocation2 + $0xcc] sm:$0xf0]  ;;  %v2588_v60 = vld [vmem:[#allocation2 + $0xc8] sm:$0xf] }
 0x641   :  { %v897_v27 = vmul.f32 %v893_v22, %v867_v62  ;;  %v898_v1 = vmul.f32 %v894_v0, %v881_v6  ;;  %v2661_v22 = vor.u32 %v3010_v63, %v2660_v17  ;;  %v3006_v0 = vld [vmem:[#allocation2 + $0x140] sm:$0xf0] }
 0x643   :  { %v901_v2 = vadd.f32 %v897_v27, %v867_v62  ;;  %v902_v3 = vadd.f32 %v898_v1, %v881_v6  ;;  %v3008_v62 = vld [vmem:[#allocation2 + $0x154] sm:$0xf]  ;;  %v2653_v6 = vor.u32 %v3009_v61, %v2652_v18  ;;  %1335 = vmatpush.bf16.msrb.mxu1 %v2661_v22  ;;  %v3005_v27 = vld [vmem:[#allocation2 + $0x13c] sm:$0xf]  ;;  %v2641_v1 = vor.u32 %v3006_v0, %v2640_v28 }
 0x644   :  { %v2657_v23 = vor.u32 %v3008_v62, %v2654_v4  ;;  %v2992_v18 = vld [vmem:[#allocation2 + $0xd0] sm:$0xf0]  ;;  %v2585_v62 = vor.u32 %v2990_v57, %v2582_v59  ;;  %v3723_v59 = vld [vmem:[%s3962_s30 + $0x20] sm:$0xff] }
 0x645   :  { %v905_v5 = vmul.f32 0.7978846, %v901_v2  ;;  %v906_v7 = vmul.f32 0.7978846, %v902_v3  ;;  %v3141_v9 = vpop.eup %3140  ;;  %v2642_v2 = vld [vmem:[#allocation2 + $0x144] sm:$0xf0] }
 0x646   :  { %v3143_v10 = vpop.eup %3142  ;;  %v911_v54 = vadd.f32 1.0, %v3141_v9  ;;  %1321 = vmatpush.bf16.msra.mxu0 %v2657_v23  ;;  %v2648_v3 = vld [vmem:[#allocation2 + $0x140] sm:$0xf] }
 0x647   :  { %3144 = vtanh.f32 %v905_v5  ;;  %v912_v55 = vadd.f32 1.0, %v3143_v10  ;;  %v3007_v5 = vld [vmem:[#allocation2 + $0x148] sm:$0xf0]  ;;  %v2628_v10 = vld [vmem:[#allocation2 + $0x120] sm:$0xf] }
 0x648   :  { %3146 = vtanh.f32 %v906_v7  ;;  %v915_v16 = vmul.f32 %v911_v54, %v883_v20  ;;  %v2645_v7 = vor.u32 %v3005_v27, %v2642_v2  ;;  %v2649_v9 = vor.u32 %v3007_v5, %v2648_v3  ;;  %v3003_v54 = vld [vmem:[#allocation2 + $0x128] sm:$0xf0]  ;;  %v2636_v20 = vld [vmem:[#allocation2 + $0x128] sm:$0xf] }
 0x649   :  { %v916_v32 = vmul.f32 %v912_v55, %v884_v25  ;;  %v2629_v55 = vor.u32 %v3003_v54, %v2628_v10 }
 0x64a   :  { %1322 = vmatpush.bf16.msra.mxu0 %v2645_v7  ;;  %1336 = vmatpush.bf16.msrb.mxu1 %v2649_v9 }
 0x64d   :  { %v3145_v13 = vpop.eup %3144 }
 0x64e   :  { %v3147_v19 = vpop.eup %3146  ;;  %v913_v24 = vadd.f32 1.0, %v3145_v13  ;;  %v3002_v13 = vld [vmem:[#allocation2 + $0x124] sm:$0xf] }
 0x64f   :  { %v914_v29 = vadd.f32 1.0, %v3147_v19  ;;  %v2630_v19 = vld [vmem:[#allocation2 + $0x12c] sm:$0xf0] }
 0x650   :  { %v917_v12 = vmul.f32 %v913_v24, %v885_v21  ;;  %v3004_v21 = vld [vmem:[#allocation2 + $0x130] sm:$0xf0]  ;;  %v2633_v24 = vor.u32 %v3002_v13, %v2630_v19 }
 0x651   :  { %v918_v33 = vmul.f32 %v914_v29, %v886_v26  ;;  %v2637_v25 = vor.u32 %v3004_v21, %v2636_v20  ;;  %v2616_v26 = vld [vmem:[#allocation2 + $0x108] sm:$0xf]  ;;  %v3000_v29 = vld [vmem:[#allocation2 + $0x110] sm:$0xf0] }
 0x652   :  { %v951_v14 = vpack.c.bf16 %v917_v12, %v915_v16  ;;  %1323 = vmatpush.bf16.msra.mxu0 %v2633_v24  ;;  %v2999_v16 = vld [vmem:[#allocation2 + $0x10c] sm:$0xf]  ;;  %v2617_v12 = vor.u32 %v3000_v29, %v2616_v26 }
 0x653   :  { %v952_v34 = vpack.c.bf16 %v918_v33, %v916_v32  ;;  %1337 = vmatpush.bf16.msrb.mxu1 %v2637_v25  ;;  %v2618_v32 = vld [vmem:[#allocation2 + $0x114] sm:$0xf0]  ;;  %v2624_v33 = vld [vmem:[#allocation2 + $0x110] sm:$0xf]  ;;  %v3089_v25 = vld [vmem:[%s3941_s17] ss:$0 sm:$0xff] }
 0x654   :  { %1061 = vmatmul.bf16.vlgmr.msra.gmra.mxu1 %v951_v14  ;;  %v3001_v14 = vld [vmem:[#allocation2 + $0x118] sm:$0xf0] }
 0x655   :  { %1075 = vmatmul.bf16.vlgmr.msrb.gmra.mxu2 %v952_v34  ;;  %v2621_v34 = vor.u32 %v2999_v16, %v2618_v32 }
 0x657   :  { %1324 = vmatpush.bf16.msra.mxu0 %v2621_v34 }
 0x6d1   :  { %v1062_v35 = vpop.f32.mrf.mxu1 }
 0x6d2   :  { %v1063_v37 = vadd.f32 %v3087_v36, %v1062_v35  ;;  %v2625_v35 = vor.u32 %v3001_v14, %v2624_v33 }
 0x6d4   :  { %1338 = vmatpush.bf16.msrb.mxu1 %v2625_v35 }
 0x6d8   :  { %v1076_v38 = vpop.f32.mrf.mxu2 }
 0x6d9   :  { %v1077_v39 = vadd.f32 %v1076_v38, %v1063_v37  ;;  %v1064_v42 = vpop.f32.mrf.mxu1  ;;  %v2997_v37 = vld [vmem:[#allocation2 + $0xf8] sm:$0xf0]  ;;  %v2996_v38 = vld [vmem:[#allocation2 + $0xf4] sm:$0xf] }
 0x6da   :  { %v1065_v40 = vadd.f32 %v3087_v36, %v1064_v42  ;;  %v2604_v36 = vld [vmem:[#allocation2 + $0xf0] sm:$0xf]  ;;  %v2612_v42 = vld [vmem:[#allocation2 + $0xf8] sm:$0xf] }
 0x6db   :  { %v1081_v41 = vadd.f32 %v1077_v39, %v3647_v30  ;;  %v2605_v39 = vor.u32 %v2997_v37, %v2604_v36 }
 0x6dd   :  { %1085 = vadd.xlane.f32.xlu0 %v1081_v41 }
 0x6e0   :  { %v1078_v43 = vpop.f32.mrf.mxu2 }
 0x6e1   :  { %v1079_v44 = vadd.f32 %v1078_v43, %v1065_v40  ;;  %v2998_v40 = vld [vmem:[#allocation2 + $0x100] sm:$0xf0] }
 0x6e3   :  { %v1082_v45 = vadd.f32 %v1079_v44, %v3649_v31  ;;  %v2664_v31 = vld [vmem:[#allocation2 + $0x168] sm:$0xf]  ;;  %v2613_v44 = vor.u32 %v2998_v40, %v2612_v42 }
 0x6e4   :  { %v2665_v56 = vor.u32 %v3012_v53, %v2664_v31 }
 0x6e5   :  { %1087 = vadd.xlane.f32.xlu1 %v1082_v45  ;;  %1339 = vmatpush.bf16.msrb.mxu1 %v2613_v44 }
 0x6e6   :  { %1306 = vmatpush.bf16.msra.mxu3 %v2665_v56  ;;  %v2991_v56 = vld [vmem:[#allocation2 + $0xc8] sm:$0xf0] }
 0x6e7   :  { %v2581_v58 = vor.u32 %v2991_v56, %v2580_v11  ;;  %v3711_v11 = vld [vmem:[%s3962_s30 + $0x10] sm:$0xff] }
 0x6ea   :  { %1307 = vmatpush.bf16.msra.mxu3 %v2653_v6  ;;  %v2589_v6 = vor.u32 %v2992_v18, %v2588_v60 }
 0x6ee   :  { %1308 = vmatpush.bf16.msra.mxu3 %v2641_v1 }
 0x6f2   :  { %1309 = vmatpush.bf16.msra.mxu3 %v2629_v55  ;;  %v3088_v55 = vld [vmem:[%s3940_s16] ss:$0 sm:$0xff] }
 0x6f6   :  { %1310 = vmatpush.bf16.msra.mxu3 %v2617_v12 }
 0x6fa   :  { %1311 = vmatpush.bf16.msra.mxu3 %v2605_v39 }
 0x750   :  { %v1086_v46 = vpop.xlane.xlu0 %1085 }
 0x751   :  { %v1089_v47 = vmul.f32 %v1086_v46, %v3463_v8  ;;  %v2994_v46 = vld [vmem:[#allocation2 + $0xe0] sm:$0xf0] }
 0x753   :  { %v3662_v48 = vsub.f32 %v1081_v41, %v1089_v47  ;;  %v2606_v41 = vld [vmem:[#allocation2 + $0xfc] sm:$0xf0]  ;;  %v2993_v47 = vld [vmem:[#allocation2 + $0xdc] sm:$0xf] }
 0x754   :  { %v2609_v43 = vor.u32 %v2996_v38, %v2606_v41 }
 0x755   :  { %v1093_v49 = vmul.f32 %v3662_v48, %v3662_v48 }
 0x756   :  { %1325 = vmatpush.bf16.msra.mxu0 %v2609_v43 }
 0x757   :  { %1095 = vadd.xlane.f32.xlu2 %v1093_v49 }
 0x758   :  { %v1088_v50 = vpop.xlane.xlu1 %1087 }
 0x759   :  { %v1090_v30 = vmul.f32 %v1088_v50, %v3463_v8  ;;  %v2594_v50 = vld [vmem:[#allocation2 + $0xe4] sm:$0xf0] }
 0x75a   :  { %v2597_v31 = vor.u32 %v2993_v47, %v2594_v50  ;;  %v3693_v47 = vld [vmem:[%s3962_s30] sm:$0xff]  ;;  %v3699_v50 = vld [vmem:[%s3962_s30 + $0x8] sm:$0xff] }
 0x75b   :  { %v3667_v51 = vsub.f32 %v1082_v45, %v1090_v30  ;;  %v2592_v45 = vld [vmem:[#allocation2 + $0xd8] sm:$0xf]  ;;  %v2600_v30 = vld [vmem:[#allocation2 + $0xe0] sm:$0xf] }
 0x75c   :  { %v2593_v49 = vor.u32 %v2994_v46, %v2592_v45  ;;  %1326 = vmatpush.bf16.msra.mxu0 %v2597_v31  ;;  %v3705_v31 = vld [vmem:[%s3962_s30 + $0x18] sm:$0xff] }
 0x75d   :  { %v1094_v52 = vmul.f32 %v3667_v51, %v3667_v51 }
 0x75e   :  { %1312 = vmatpush.bf16.msra.mxu3 %v2593_v49 }
 0x75f   :  { %1097 = vadd.xlane.f32.xlu0 %v1094_v52  ;;  %v2995_v52 = vld [vmem:[#allocation2 + $0xe8] sm:$0xf0] }
 0x760   :  { %v2601_v53 = vor.u32 %v2995_v52, %v2600_v30  ;;  %1327 = vmatpush.bf16.msra.mxu0 %v2585_v62 }
 0x762   :  { %1340 = vmatpush.bf16.msrb.mxu1 %v2601_v53  ;;  %1313 = vmatpush.bf16.msra.mxu3 %v2581_v58 }
 0x766   :  { %1341 = vmatpush.bf16.msrb.mxu1 %v2589_v6  ;;  %v3735_v6 = vld [vmem:[%s3962_s30 + $0x30] sm:$0xff] }
 0x7ca   :  { %v1096_v15 = vpop.xlane.xlu2 %1095 }
 0x7cb   :  { %v1099_v61 = vmul.f32 %v1096_v15, %v3463_v8  ;;  %v3717_v15 = vld [vmem:[%s3962_s30 + $0x28] sm:$0xff] }
 0x7cd   :  { %v1101_v4 = vadd.f32 1e-12, %v1099_v61  ;;  %v3729_v61 = vld [vmem:[%s3962_s30 + $0x38] sm:$0xff]  ;;  %s3964_s30 = sld [smem:[#allocation15_spill]] }
 0x7cf   :  { %3148 = vrsqrt.f32 %v1101_v4  ;;  %vm1109_vm15 = vweird.f32 %v1101_v4 }
 0x7d2   :  { %v1098_v17 = vpop.xlane.xlu0 %1097 }
 0x7d3   :  { %v1100_v63 = vmul.f32 %v1098_v17, %v3463_v8 }
 0x7d5   :  { %v3149_v23 = vpop.eup %3148  ;;  %v1102_v22 = vadd.f32 1e-12, %v1100_v63 }
 0x7d6   :  { %v1104_v28 = vmul.f32 %v3149_v23, %v1101_v4  ;;  %vm1110_vm14 = vweird.f32 %v3149_v23 }
 0x7d7   :  { %3150 = vrsqrt.f32 %v1102_v22  ;;  %vm1111_vm0 = vmor %vm1109_vm15, %vm1110_vm14  ;;  %vm1119_vm2 = vweird.f32 %v1102_v22 }
 0x7d8   :  { %v1105_v0 = vmul.f32 %v3149_v23, %v1104_v28 }
 0x7da   :  { %v1106_v27 = vmul.f32 0.5, %v1105_v0 }
 0x7dc   :  { %v1107_v1 = vsub.f32 1.5, %v1106_v27 }
 0x7dd   :  { %v3151_v2 = vpop.eup %3150 }
 0x7de   :  { %v1108_v3 = vmul.f32 %v3149_v23, %v1107_v1  ;;  %v1114_v5 = vmul.f32 %v3151_v2, %v1102_v22  ;;  %vm1120_vm1 = vweird.f32 %v3151_v2  ;;  %v3212_v22 = vld [vmem:[%s3963_s28] sm:$0xff] }
 0x7df   :  { %vm1121_vm3 = vmor %vm1119_vm2, %vm1120_vm1 }
 0x7e0   :  { %v1115_v7 = vmul.f32 %v3151_v2, %v1114_v5  ;;  %v1112_v9 = vsel %vm1111_vm0, %v3149_v23, %v1108_v3 }
 0x7e1   :  { %v1123_v13 = vmul.f32 %v1112_v9, %v3662_v48 }
 0x7e2   :  { %v1116_v10 = vmul.f32 0.5, %v1115_v7 }
 0x7e3   :  { %v1128_v24 = vmul.f32 %v3088_v55, %v1123_v13 }
 0x7e4   :  { %v1117_v54 = vsub.f32 1.5, %v1116_v10  ;;  %v3214_v10 = vld [vmem:[%s3963_s28 + $0x10] sm:$0xff] }
 0x7e5   :  { %v3681_v29 = vadd.f32 %v3089_v25, %v1128_v24 }
 0x7e6   :  { %v1118_v19 = vmul.f32 %v3151_v2, %v1117_v54 }
 0x7e8   :  { %v1122_v20 = vsel %vm1121_vm3, %v3151_v2, %v1118_v19  ;;  %v3213_v2 = vld [vmem:[%s3963_s28 + $0x8] sm:$0xff] }
 0x7e9   :  { %v1124_v21 = vmul.f32 %v1122_v20, %v3667_v51  ;;  %v2577_v51 = vld [vmem:[%s3931_s7 + $0x3] sm:$0x7]  ;;  %v3215_v20 = vld [vmem:[%s3963_s28 + $0x18] sm:$0xff] }
 0x7ea   :  { %v1173_v33 = vperm.slane %v2577_v51, 1  ;;  %v1174_v14 = vperm.slane %v2577_v51, 2  ;;  %v1172_v37 = vperm.slane %v2577_v51, 0 }
 0x7eb   :  { %v1129_v26 = vmul.f32 %v3088_v55, %v1124_v21 }
 0x7ed   :  { %v3683_v16 = vadd.f32 %v3089_v25, %v1129_v26 }
 0x7ef   :  { %v1168_v48 = vpack.c.bf16 %v3683_v16, %v3681_v29 }
 0x7f1   :  { %1314 = vmatmul.bf16.vlgmr.msra.gmra.mxu3 %v1168_v48  ;;  %1328 = vmatmul.bf16.vlgmr.msra.gmra.mxu0 %v1168_v48 }
 0x7f2   :  { %1342 = vmatmul.bf16.vlgmr.msrb.gmra.mxu1 %v1168_v48  ;;  %v3216_v48 = vld [vmem:[%s3963_s28 + $0x20] sm:$0xff] }
 0x86e   :  { %v1329_v12 = vpop.f32.mrf.mxu0 }
 0x86f   :  { %v1343_v32 = vpop.f32.mrf.mxu1  ;;  %v1330_v36 = vadd.f32 %v1329_v12, %v1173_v33 }
 0x870   :  { %v1344_v41 = vadd.f32 %v1343_v32, %v1174_v14 }
 0x874   :  { %v1315_v34 = vpop.f32.mrf.mxu3 }
 0x875   :  { %v1316_v44 = vadd.f32 %v1315_v34, %v1172_v37 }
 0x876   :  { %v1331_v35 = vpop.f32.mrf.mxu0 }
 0x877   :  { %v1332_v38 = vadd.f32 %v1331_v35, %v1173_v33  ;;  %v1345_v39 = vpop.f32.mrf.mxu1  ;;  %v1350_v49 = vmul.f32 %v3693_v47, %v1316_v44  ;;  %v1352_v56 = vmul.f32 %v3711_v11, %v1316_v44  ;;  %v1354_v60 = vmul.f32 %v3723_v59, %v1316_v44 }
 0x878   :  { %v1346_v42 = vadd.f32 %v1345_v39, %v1174_v14  ;;  %v1356_v4 = vmul.f32 %v3735_v6, %v1316_v44  ;;  %v3217_v14 = vld [vmem:[%s3963_s28 + $0x28] sm:$0xff] }
 0x879   :  { %v1348_v40 = vpack.c.bf16 %v1332_v38, %v1330_v36  ;;  %v3218_v38 = vld [vmem:[%s3963_s28 + $0x30] sm:$0xff] }
 0x87a   :  { %v1349_v43 = vpack.c.bf16 %v1346_v42, %v1344_v41 }
 0x87b   :  { %1369 = vmatpush.bf16.xpose.msra.mxu2 %v1348_v40 }
 0x87c   :  { %1518 = vmatpush.bf16.msrb.mxu3 %v1349_v43  ;;  %v1317_v45 = vpop.f32.mrf.mxu3  ;;  %v3219_v43 = vld [vmem:[%s3963_s28 + $0x38] sm:$0xff] }
 0x87d   :  { %v1318_v46 = vadd.f32 %v1317_v45, %v1172_v37 }
 0x87f   :  { %v1351_v30 = vmul.f32 %v3699_v50, %v1318_v46  ;;  %v1353_v53 = vmul.f32 %v3705_v31, %v1318_v46  ;;  %v1355_v58 = vmul.f32 %v3717_v15, %v1318_v46  ;;  %v1357_v62 = vmul.f32 %v3729_v61, %v1318_v46 }
 0x881   :  { %v1358_v52 = vpack.c.bf16 %v1351_v30, %v1350_v49  ;;  %v1359_v57 = vpack.c.bf16 %v1353_v53, %v1352_v56  ;;  %v1360_v18 = vpack.c.bf16 %v1355_v58, %v1354_v60  ;;  %v1361_v17 = vpack.c.bf16 %v1357_v62, %v1356_v4 }
 0x883   :  { %1370 = vmatmul.bf16.vlgmr.msra.gmra.mxu2 %v1358_v52 }
 0x893   :  { %1375 = vmatmul.bf16.gmra.mxu2 %v1359_v57 }
 0x8a3   :  { %1380 = vmatmul.bf16.gmra.mxu2 %v1360_v18 }
 0x8b3   :  { %1385 = vmatmul.bf16.gmra.mxu2 %v1361_v17 }
 0x906   :  { %v1371_v63 = vpop.f32.mrf.mxu2 }
 0x907   :  { %v1391_v23 = vmul.f32 0.17677669, %v1371_v63 }
 0x909   :  { %v1399_v28 = vadd.f32 %v3212_v22, %v1391_v23 }
 0x90b   :  { %v1407_v0 = vsel %vm467_vm7, %v1399_v28, -inf }
 0x90c   :  { %1408 = vmax.xlane.f32.xlu1 %v1407_v0 }
 0x90e   :  { %v1373_v27 = vpop.f32.mrf.mxu2 }
 0x90f   :  { %v1392_v1 = vmul.f32 0.17677669, %v1373_v27 }
 0x911   :  { %v1400_v3 = vadd.f32 %v3213_v2, %v1392_v1 }
 0x913   :  { %v1410_v5 = vsel %vm467_vm7, %v1400_v3, -inf }
 0x914   :  { %1411 = vmax.xlane.f32.xlu2 %v1410_v5 }
 0x916   :  { %v1376_v7 = vpop.f32.mrf.mxu2 }
 0x917   :  { %v1393_v9 = vmul.f32 0.17677669, %v1376_v7 }
 0x919   :  { %v1401_v54 = vadd.f32 %v3214_v10, %v1393_v9 }
 0x91b   :  { %v1413_v13 = vsel %vm467_vm7, %v1401_v54, -inf }
 0x91c   :  { %1414 = vmax.xlane.f32.xlu0 %v1413_v13 }
 0x91e   :  { %v1378_v55 = vpop.f32.mrf.mxu2 }
 0x91f   :  { %v1394_v19 = vmul.f32 0.17677669, %v1378_v55 }
 0x921   :  { %v1402_v21 = vadd.f32 %v3215_v20, %v1394_v19 }
 0x923   :  { %v1416_v24 = vsel %vm467_vm7, %v1402_v21, -inf }
 0x924   :  { %1417 = vmax.xlane.f32.xlu1 %v1416_v24 }
 0x926   :  { %v1381_v25 = vpop.f32.mrf.mxu2 }
 0x927   :  { %v1395_v26 = vmul.f32 0.17677669, %v1381_v25 }
 0x929   :  { %v1403_v12 = vadd.f32 %v3216_v48, %v1395_v26 }
 0x92b   :  { %v1419_v32 = vsel %vm467_vm7, %v1403_v12, -inf }
 0x92c   :  { %1420 = vmax.xlane.f32.xlu2 %v1419_v32 }
 0x92e   :  { %v1383_v51 = vpop.f32.mrf.mxu2 }
 0x92f   :  { %v1396_v33 = vmul.f32 0.17677669, %v1383_v51 }
 0x931   :  { %v1404_v34 = vadd.f32 %v3217_v14, %v1396_v33 }
 0x933   :  { %v1422_v35 = vsel %vm467_vm7, %v1404_v34, -inf }
 0x934   :  { %1423 = vmax.xlane.f32.xlu0 %v1422_v35 }
 0x936   :  { %v1386_v36 = vpop.f32.mrf.mxu2 }
 0x937   :  { %v1397_v37 = vmul.f32 0.17677669, %v1386_v36 }
 0x939   :  { %v1405_v39 = vadd.f32 %v3218_v38, %v1397_v37 }
 0x93b   :  { %v1425_v41 = vsel %vm467_vm7, %v1405_v39, -inf }
 0x93c   :  { %1426 = vmax.xlane.f32.xlu1 %v1425_v41 }
 0x93e   :  { %v1388_v42 = vpop.f32.mrf.mxu2 }
 0x93f   :  { %v1398_v40 = vmul.f32 0.17677669, %v1388_v42 }
 0x941   :  { %v1406_v44 = vadd.f32 %v3219_v43, %v1398_v40 }
 0x943   :  { %v1428_v45 = vsel %vm467_vm7, %v1406_v44, -inf }
 0x944   :  { %1429 = vmax.xlane.f32.xlu2 %v1428_v45 }
 0x97f   :  { %v1409_v46 = vpop.xlane.xlu1 %1408 }
 0x980   :  { %v1431_v49 = vsub.f32 %v1399_v28, %v1409_v46 }
 0x982   :  { %v1439_v30 = vmul.f32 1.442695, %v1431_v49 }
 0x984   :  { %3152 = vpow2.f32 %v1439_v30 }
 0x987   :  { %v1412_v52 = vpop.xlane.xlu2 %1411 }
 0x988   :  { %v1432_v53 = vsub.f32 %v1400_v3, %v1412_v52 }
 0x98a   :  { %v3153_v56 = vpop.eup %3152  ;;  %v1441_v57 = vmul.f32 1.442695, %v1432_v53 }
 0x98b   :  { %v1455_v58 = vsel %vm467_vm7, %v3153_v56, 0.0 }
 0x98c   :  { %3154 = vpow2.f32 %v1441_v57  ;;  %1456 = vadd.xlane.f32.xlu0 %v1455_v58 }
 0x98f   :  { %v1415_v60 = vpop.xlane.xlu0 %1414 }
 0x990   :  { %v1433_v18 = vsub.f32 %v1401_v54, %v1415_v60 }
 0x992   :  { %v3155_v62 = vpop.eup %3154  ;;  %v1443_v4 = vmul.f32 1.442695, %v1433_v18 }
 0x993   :  { %v1458_v17 = vsel %vm467_vm7, %v3155_v62, 0.0 }
 0x994   :  { %3156 = vpow2.f32 %v1443_v4  ;;  %1459 = vadd.xlane.f32.xlu1 %v1458_v17 }
 0x997   :  { %v1418_v63 = vpop.xlane.xlu1 %1417 }
 0x998   :  { %v1434_v23 = vsub.f32 %v1402_v21, %v1418_v63 }
 0x99a   :  { %v3157_v22 = vpop.eup %3156  ;;  %v1445_v28 = vmul.f32 1.442695, %v1434_v23 }
 0x99b   :  { %v1461_v0 = vsel %vm467_vm7, %v3157_v22, 0.0 }
 0x99c   :  { %3158 = vpow2.f32 %v1445_v28  ;;  %1462 = vadd.xlane.f32.xlu2 %v1461_v0  ;;  %v3020_v0 = vld [vmem:[%s3932_s8 + $0x70] sm:$0xff] }
 0x99f   :  { %v1421_v27 = vpop.xlane.xlu2 %1420 }
 0x9a0   :  { %v1435_v1 = vsub.f32 %v1403_v12, %v1421_v27  ;;  %v3019_v27 = vld [vmem:[%s3932_s8 + $0x68] sm:$0xff] }
 0x9a2   :  { %v3159_v2 = vpop.eup %3158  ;;  %v1447_v3 = vmul.f32 1.442695, %v1435_v1 }
 0x9a3   :  { %v1464_v5 = vsel %vm467_vm7, %v3159_v2, 0.0 }
 0x9a4   :  { %3160 = vpow2.f32 %v1447_v3  ;;  %1465 = vadd.xlane.f32.xlu0 %v1464_v5  ;;  %v3017_v3 = vld [vmem:[%s3932_s8 + $0x58] sm:$0xff] }
 0x9a7   :  { %v1424_v7 = vpop.xlane.xlu0 %1423 }
 0x9a8   :  { %v1436_v9 = vsub.f32 %v1404_v34, %v1424_v7  ;;  %v3016_v7 = vld [vmem:[%s3932_s8 + $0x50] sm:$0xff] }
 0x9aa   :  { %v3161_v10 = vpop.eup %3160  ;;  %v1449_v54 = vmul.f32 1.442695, %v1436_v9  ;;  %v3015_v9 = vld [vmem:[%s3932_s8 + $0x48] sm:$0xff] }
 0x9ab   :  { %v1467_v13 = vsel %vm467_vm7, %v3161_v10, 0.0 }
 0x9ac   :  { %3162 = vpow2.f32 %v1449_v54  ;;  %1468 = vadd.xlane.f32.xlu1 %v1467_v13  ;;  %v3014_v54 = vld [vmem:[%s3932_s8 + $0x40] sm:$0xff] }
 0x9af   :  { %v1427_v55 = vpop.xlane.xlu1 %1426 }
 0x9b0   :  { %v1437_v19 = vsub.f32 %v1405_v39, %v1427_v55 }
 0x9b2   :  { %v3163_v20 = vpop.eup %3162  ;;  %v1451_v21 = vmul.f32 1.442695, %v1437_v19 }
 0x9b3   :  { %v1470_v24 = vsel %vm467_vm7, %v3163_v20, 0.0 }
 0x9b4   :  { %3164 = vpow2.f32 %v1451_v21  ;;  %1471 = vadd.xlane.f32.xlu2 %v1470_v24 }
 0x9b7   :  { %v1430_v25 = vpop.xlane.xlu2 %1429 }
 0x9b8   :  { %v1438_v26 = vsub.f32 %v1406_v44, %v1430_v25 }
 0x9ba   :  { %v3165_v48 = vpop.eup %3164  ;;  %v1453_v12 = vmul.f32 1.442695, %v1438_v26 }
 0x9bb   :  { %v1473_v32 = vsel %vm467_vm7, %v3165_v48, 0.0 }
 0x9bc   :  { %3166 = vpow2.f32 %v1453_v12  ;;  %1474 = vadd.xlane.f32.xlu0 %v1473_v32 }
 0x9c2   :  { %v3167_v51 = vpop.eup %3166 }
 0x9c3   :  { %v1476_v33 = vsel %vm467_vm7, %v3167_v51, 0.0 }
 0x9c4   :  { %1477 = vadd.xlane.f32.xlu1 %v1476_v33 }
 0x9ff   :  { %v1457_v14 = vpop.xlane.xlu0 %1456 }
 0xa00   :  { %3168 = vrcp.f32 %v1457_v14 }
 0xa06   :  { %v3169_v35 = vpop.eup %3168 }
 0xa07   :  { %v1460_v34 = vpop.xlane.xlu1 %1459  ;;  %v1487_v37 = vmul.f32 %v3169_v35, %v3153_v56 }
 0xa08   :  { %3170 = vrcp.f32 %v1460_v34 }
 0xa0e   :  { %v3171_v36 = vpop.eup %3170 }
 0xa0f   :  { %v1488_v38 = vmul.f32 %v3171_v36, %v3155_v62  ;;  %v1463_v41 = vpop.xlane.xlu2 %1462 }
 0xa10   :  { %3172 = vrcp.f32 %v1463_v41 }
 0xa11   :  { %v1495_v39 = vpack.c.bf16 %v1488_v38, %v1487_v37 }
 0xa13   :  { %2674 = vmatmul.msk.bf16.vlgmr.msrb.gmra.mxu3 %vm467_vm7, %v1495_v39 }
 0xa16   :  { %v3173_v40 = vpop.eup %3172 }
 0xa17   :  { %v1466_v42 = vpop.xlane.xlu0 %1465  ;;  %v1489_v44 = vmul.f32 %v3173_v40, %v3157_v22  ;;  %v3021_v22 = vld [vmem:[%s3932_s8 + $0x78] sm:$0xff] }
 0xa18   :  { %3174 = vrcp.f32 %v1466_v42  ;;  %1625 = vmatpush.bf16.msrb.mxu0 %v3021_v22 }
 0xa1c   :  { %1626 = vmatpush.bf16.msrb.mxu0 %v3020_v0  ;;  %v3031_v0 = vld [vmem:[#allocation5 + $0xc4] sm:$0xf0] }
 0xa1e   :  { %v3175_v43 = vpop.eup %3174 }
 0xa1f   :  { %v1490_v45 = vmul.f32 %v3175_v43, %v3159_v2  ;;  %v1469_v49 = vpop.xlane.xlu1 %1468  ;;  %v3018_v2 = vld [vmem:[%s3932_s8 + $0x60] sm:$0xff]  ;;  %s2306_s8 = sshll.u32 %s3965_s14, 4  ;;  %s2307_s8 = int_to_ptr.hbm [resolvable:$true] %s2306_s8 }
 0xa20   :  { %3176 = vrcp.f32 %v1469_v49  ;;  %1627 = vmatpush.bf16.msrb.mxu0 %v3019_v27  ;;  %v3030_v27 = vld [vmem:[#allocation5 + $0xc4] sm:$0xf] }
 0xa21   :  { %v1496_v46 = vpack.c.bf16 %v1490_v45, %v1489_v44  ;;  %v3037_v45 = vld [vmem:[#allocation5 + $0xf4] sm:$0xf0] }
 0xa23   :  { %2675 = vmatmul.msk.bf16.gmra.mxu3 %vm467_vm7, %v1496_v46  ;;  %v3036_v46 = vld [vmem:[#allocation5 + $0xf4] sm:$0xf] }
 0xa24   :  { %1628 = vmatpush.bf16.msrb.mxu0 %v3018_v2  ;;  %v2766_v2 = vld [vmem:[#allocation5 + $0xc8] sm:$0xf0] }
 0xa26   :  { %v3177_v52 = vpop.eup %3176 }
 0xa27   :  { %v1472_v30 = vpop.xlane.xlu2 %1471  ;;  %v1491_v56 = vmul.f32 %v3177_v52, %v3161_v10 }
 0xa28   :  { %3178 = vrcp.f32 %v1472_v30  ;;  %1629 = vmatpush.bf16.msrb.mxu0 %v3017_v3  ;;  %v2790_v30 = vld [vmem:[#allocation5 + $0xf8] sm:$0xf0]  ;;  %v2769_v3 = vor.u32 %v3030_v27, %v2766_v2  ;;  %v3051_v27 = vld [vmem:[#allocation7 + $0xe8] sm:$0xff] }
 0xa29   :  { %v2793_v52 = vor.u32 %v3036_v46, %v2790_v30  ;;  %v3041_v2 = vld [vmem:[#allocation7 + $0x98] sm:$0xff] }
 0xa2c   :  { %1630 = vmatpush.bf16.msrb.mxu0 %v3016_v7  ;;  %v3029_v7 = vld [vmem:[#allocation5 + $0xb4] sm:$0xf0] }
 0xa2e   :  { %v3179_v53 = vpop.eup %3178 }
 0xa2f   :  { %v1492_v57 = vmul.f32 %v3179_v53, %v3163_v20  ;;  %v1475_v60 = vpop.xlane.xlu0 %1474  ;;  %v2780_v53 = vld [vmem:[#allocation5 + $0xe0] sm:$0xf] }
 0xa30   :  { %3180 = vrcp.f32 %v1475_v60  ;;  %1631 = vmatpush.bf16.msrb.mxu0 %v3015_v9  ;;  %v2782_v60 = vld [vmem:[#allocation5 + $0xe8] sm:$0xf0]  ;;  %v3028_v9 = vld [vmem:[#allocation5 + $0xb4] sm:$0xf] }
 0xa31   :  { %v1497_v58 = vpack.c.bf16 %v1492_v57, %v1491_v56  ;;  %v3035_v56 = vld [vmem:[#allocation5 + $0xe4] sm:$0xf0]  ;;  %v3034_v57 = vld [vmem:[#allocation5 + $0xe4] sm:$0xf] }
 0xa33   :  { %2676 = vmatmul.msk.bf16.gmra.mxu3 %vm467_vm7, %v1497_v58  ;;  %v2781_v58 = vor.u32 %v3035_v56, %v2780_v53 }
 0xa34   :  { %1632 = vmatpush.bf16.msrb.mxu0 %v3014_v54  ;;  %v2758_v54 = vld [vmem:[#allocation5 + $0xb8] sm:$0xf0] }
 0xa36   :  { %v3181_v62 = vpop.eup %3180 }
 0xa37   :  { %v1478_v18 = vpop.xlane.xlu1 %1477  ;;  %v1493_v17 = vmul.f32 %v3181_v62, %v3165_v48  ;;  %v2772_v62 = vld [vmem:[#allocation5 + $0xd0] sm:$0xf] }
 0xa38   :  { %3182 = vrcp.f32 %v1478_v18  ;;  %1814 = vmatpush.bf16.msra.mxu0 %v2793_v52  ;;  %v2785_v18 = vor.u32 %v3034_v57, %v2782_v60 }
 0xa3c   :  { %1815 = vmatpush.bf16.msra.mxu0 %v2785_v18  ;;  %v3091_v18 = vld [vmem:[%s3934_s10 + $0x1] ss:$0 sm:$0xff] }
 0xa3e   :  { %v3183_v4 = vpop.eup %3182 }
 0xa3f   :  { %v1494_v63 = vmul.f32 %v3183_v4, %v3167_v51  ;;  %v3033_v4 = vld [vmem:[#allocation5 + $0xd4] sm:$0xf0] }
 0xa41   :  { %v1498_v23 = vpack.c.bf16 %v1494_v63, %v1493_v17  ;;  %v3032_v17 = vld [vmem:[#allocation5 + $0xd4] sm:$0xf]  ;;  %v2773_v63 = vor.u32 %v3033_v4, %v2772_v62 }
 0xa43   :  { %2677 = vmatmul.msk.bf16.gmra.mxu3 %vm467_vm7, %v1498_v23  ;;  %v2774_v23 = vld [vmem:[#allocation5 + $0xd8] sm:$0xf0] }
 0xa44   :  { %v2777_v22 = vor.u32 %v3032_v17, %v2774_v23  ;;  %v3092_v23 = vld [vmem:[%s3935_s11 + $0x1] ss:$0 sm:$0xff] }
 0xa46   :  { %1816 = vmatpush.bf16.msra.mxu0 %v2777_v22 }
 0xa4a   :  { %1817 = vmatpush.bf16.msra.mxu0 %v2769_v3  ;;  %v3049_v3 = vld [vmem:[#allocation7 + $0xd8] sm:$0xff] }
 0xa96   :  { %v1520_v28 = vpop.f32.mrf.mxu3 }
 0xa97   :  { %v1540_v24 = vmul.f32 %v3693_v47, %v1520_v28  ;;  %v3090_v47 = vld [vmem:[%s3933_s9 + $0x1] ss:$0 sm:$0xff] }
 0xa98   :  { %v2764_v28 = vld [vmem:[#allocation5 + $0xc0] sm:$0xf] }
 0xa9e   :  { %v1522_v1 = vpop.f32.mrf.mxu3 }
 0xa9f   :  { %v1541_v25 = vmul.f32 %v3699_v50, %v1522_v1  ;;  %v2765_v1 = vor.u32 %v3031_v0, %v2764_v28 }
 0xaa6   :  { %v1525_v5 = vpop.f32.mrf.mxu3 }
 0xaa7   :  { %v1542_v20 = vmul.f32 %v3711_v11, %v1525_v5  ;;  %v2756_v5 = vld [vmem:[#allocation5 + $0xb0] sm:$0xf] }
 0xaa9   :  { %v1548_v12 = vadd.f32 %v1542_v20, %v1540_v24  ;;  %v3026_v20 = vld [vmem:[#allocation5 + $0xa4] sm:$0xf]  ;;  %v2750_v24 = vld [vmem:[#allocation5 + $0xa8] sm:$0xf0] }
 0xaae   :  { %v1527_v10 = vpop.f32.mrf.mxu3 }
 0xaaf   :  { %v1543_v21 = vmul.f32 %v3705_v31, %v1527_v10  ;;  %v2757_v10 = vor.u32 %v3029_v7, %v2756_v5  ;;  %v3040_v5 = vld [vmem:[#allocation7 + $0x90] sm:$0xff] }
 0xab0   :  { %v3048_v7 = vld [vmem:[#allocation7 + $0xd0] sm:$0xff] }
 0xab1   :  { %v1549_v32 = vadd.f32 %v1543_v21, %v1541_v25  ;;  %v2753_v25 = vor.u32 %v3026_v20, %v2750_v24 }
 0xab6   :  { %v1530_v13 = vpop.f32.mrf.mxu3 }
 0xab7   :  { %v1544_v26 = vmul.f32 %v3723_v59, %v1530_v13  ;;  %v2761_v13 = vor.u32 %v3028_v9, %v2758_v54  ;;  %v3039_v9 = vld [vmem:[#allocation7 + $0x88] sm:$0xff]  ;;  %v2729_v54 = vld [vmem:[%s3937_s13 + $0x2] sm:$0x3] }
 0xab8   :  { %v1717_v20 = vperm.slane %v2729_v54, 1 }
 0xab9   :  { %v1550_v14 = vadd.f32 %v1548_v12, %v1544_v26  ;;  %1818 = vmatpush.bf16.msra.mxu0 %v2761_v13  ;;  %v2740_v26 = vld [vmem:[#allocation5 + $0x90] sm:$0xf]  ;;  %v3024_v12 = vld [vmem:[#allocation5 + $0x94] sm:$0xf]  ;;  %v3038_v13 = vld [vmem:[#allocation7 + $0x80] sm:$0xff] }
 0xabd   :  { %1819 = vmatpush.bf16.msra.mxu0 %v2753_v25 }
 0xabe   :  { %v1532_v55 = vpop.f32.mrf.mxu3 }
 0xabf   :  { %v1545_v48 = vmul.f32 %v3717_v15, %v1532_v55  ;;  %v2748_v55 = vld [vmem:[#allocation5 + $0xa0] sm:$0xf] }
 0xac1   :  { %v1551_v34 = vadd.f32 %v1549_v32, %v1545_v48  ;;  %v3025_v48 = vld [vmem:[#allocation5 + $0x94] sm:$0xf0] }
 0xac2   :  { %v2741_v32 = vor.u32 %v3025_v48, %v2740_v26 }
 0xac6   :  { %v1535_v19 = vpop.f32.mrf.mxu3 }
 0xac7   :  { %v1546_v51 = vmul.f32 %v3735_v6, %v1535_v19  ;;  %v3027_v19 = vld [vmem:[#allocation5 + $0xa4] sm:$0xf0] }
 0xac8   :  { %v2749_v21 = vor.u32 %v3027_v19, %v2748_v55  ;;  %v3046_v55 = vld [vmem:[#allocation7 + $0xc0] sm:$0xff]  ;;  %v1716_v19 = vperm.slane %v2729_v54, 0 }
 0xac9   :  { %v1552_v11 = vadd.f32 %v1550_v14, %v1546_v51  ;;  %v2742_v51 = vld [vmem:[#allocation5 + $0x98] sm:$0xf0]  ;;  %v3023_v14 = vld [vmem:[#allocation5 + $0x84] sm:$0xf0] }
 0xace   :  { %v1537_v33 = vpop.f32.mrf.mxu3 }
 0xacf   :  { %v1547_v35 = vmul.f32 %v3729_v61, %v1537_v33  ;;  %v2732_v33 = vld [vmem:[#allocation5 + $0x80] sm:$0xf] }
 0xad1   :  { %v1553_v36 = vadd.f32 %v1551_v34, %v1547_v35  ;;  %v2745_v35 = vor.u32 %v3024_v12, %v2742_v51 }
 0xad3   :  { %v1571_v31 = vpack.c.bf16 %v1553_v36, %v1552_v11  ;;  %v3022_v11 = vld [vmem:[#allocation5 + $0x84] sm:$0xf]  ;;  %v2734_v36 = vld [vmem:[#allocation5 + $0x88] sm:$0xf0]  ;;  %1820 = vmatpush.bf16.msra.mxu0 %v2745_v35 }
 0xad5   :  { %1633 = vmatmul.bf16.vlgmr.msrb.gmra.mxu0 %v1571_v31 }
 0xb52   :  { %v1634_v50 = vpop.f32.mrf.mxu0 }
 0xb53   :  { %v1635_v59 = vadd.f32 %v3090_v47, %v1634_v50  ;;  %v2737_v50 = vor.u32 %v3022_v11, %v2734_v36 }
 0xb55   :  { %v1639_v15 = vadd.f32 %v1635_v59, %v3681_v29  ;;  %1821 = vmatpush.bf16.msra.mxu0 %v2737_v50 }
 0xb57   :  { %1645 = vadd.xlane.f32.xlu2 %v1639_v15 }
 0xb5a   :  { %v1636_v37 = vpop.f32.mrf.mxu0 }
 0xb5b   :  { %v1637_v6 = vadd.f32 %v3090_v47, %v1636_v37  ;;  %v2733_v47 = vor.u32 %v3023_v14, %v2732_v33  ;;  %v3053_v37 = vld [vmem:[#allocation7 + $0xf8] sm:$0xff] }
 0xb5c   :  { %2014 = vmatpush.bf16.msra.mxu3 %v3053_v37 }
 0xb5d   :  { %v1640_v38 = vadd.f32 %v1637_v6, %v3683_v16  ;;  %v2788_v16 = vld [vmem:[#allocation5 + $0xf0] sm:$0xf] }
 0xb5e   :  { %v2789_v49 = vor.u32 %v3037_v45, %v2788_v16 }
 0xb5f   :  { %1647 = vadd.xlane.f32.xlu0 %v1640_v38 }
 0xb60   :  { %1800 = vmatpush.bf16.msra.mxu1 %v2789_v49 }
 0xb64   :  { %1801 = vmatpush.bf16.msra.mxu1 %v2781_v58 }
 0xb68   :  { %1802 = vmatpush.bf16.msra.mxu1 %v2773_v63 }
 0xb6c   :  { %1803 = vmatpush.bf16.msra.mxu1 %v2765_v1  ;;  %v3042_v1 = vld [vmem:[#allocation7 + $0xa0] sm:$0xff] }
 0xb70   :  { %1804 = vmatpush.bf16.msra.mxu1 %v2757_v10  ;;  %v3047_v10 = vld [vmem:[#allocation7 + $0xc8] sm:$0xff] }
 0xb74   :  { %1805 = vmatpush.bf16.msra.mxu1 %v2749_v21 }
 0xb78   :  { %1806 = vmatpush.bf16.msra.mxu1 %v2741_v32 }
 0xb7c   :  { %1807 = vmatpush.bf16.msra.mxu1 %v2733_v47 }
 0xbca   :  { %v1646_v39 = vpop.xlane.xlu2 %1645 }
 0xbcb   :  { %v1649_v61 = vmul.f32 %v1646_v39, %v3463_v8  ;;  %v3044_v39 = vld [vmem:[#allocation7 + $0xb0] sm:$0xff] }
 0xbcd   :  { %v3820_v41 = vsub.f32 %v1639_v15, %v1649_v61  ;;  %v3045_v15 = vld [vmem:[#allocation7 + $0xb8] sm:$0xff]  ;;  %v3052_v61 = vld [vmem:[#allocation7 + $0xf0] sm:$0xff] }
 0xbce   :  { %2000 = vmatpush.bf16.msrb.mxu2 %v3045_v15  ;;  %2015 = vmatpush.bf16.msra.mxu3 %v3052_v61 }
 0xbcf   :  { %v1653_v42 = vmul.f32 %v3820_v41, %v3820_v41 }
 0xbd1   :  { %1655 = vadd.xlane.f32.xlu1 %v1653_v42 }
 0xbd2   :  { %v1648_v40 = vpop.xlane.xlu0 %1647  ;;  %2001 = vmatpush.bf16.msrb.mxu2 %v3044_v39  ;;  %2016 = vmatpush.bf16.msra.mxu3 %v3051_v27 }
 0xbd3   :  { %v1650_v43 = vmul.f32 %v1648_v40, %v3463_v8 }
 0xbd5   :  { %v3825_v44 = vsub.f32 %v1640_v38, %v1650_v43 }
 0xbd7   :  { %v1654_v29 = vmul.f32 %v3825_v44, %v3825_v44 }
 0xbd9   :  { %1657 = vadd.xlane.f32.xlu2 %v1654_v29  ;;  %v3043_v29 = vld [vmem:[#allocation7 + $0xa8] sm:$0xff] }
 0xbda   :  { %2002 = vmatpush.bf16.msrb.mxu2 %v3043_v29 }
 0xbde   :  { %2003 = vmatpush.bf16.msrb.mxu2 %v3042_v1 }
 0xbe2   :  { %2004 = vmatpush.bf16.msrb.mxu2 %v3041_v2 }
 0xbe6   :  { %2005 = vmatpush.bf16.msrb.mxu2 %v3040_v5 }
 0xbea   :  { %2006 = vmatpush.bf16.msrb.mxu2 %v3039_v9 }
 0xbee   :  { %2007 = vmatpush.bf16.msrb.mxu2 %v3038_v13 }
 0xc44   :  { %v1656_v34 = vpop.xlane.xlu1 %1655 }
 0xc45   :  { %v1659_v31 = vmul.f32 %v1656_v34, %v3463_v8 }
 0xc47   :  { %v1661_v59 = vadd.f32 1e-12, %v1659_v31 }
 0xc49   :  { %3184 = vrsqrt.f32 %v1661_v59  ;;  %vm1669_vm5 = vweird.f32 %v1661_v59 }
 0xc4c   :  { %v1658_v6 = vpop.xlane.xlu2 %1657 }
 0xc4d   :  { %v1660_v38 = vmul.f32 %v1658_v6, %v3463_v8 }
 0xc4f   :  { %v3185_v42 = vpop.eup %3184  ;;  %v1662_v40 = vadd.f32 1e-12, %v1660_v38 }
 0xc50   :  { %v1664_v43 = vmul.f32 %v3185_v42, %v1661_v59  ;;  %vm1670_vm4 = vweird.f32 %v3185_v42 }
 0xc51   :  { %3186 = vrsqrt.f32 %v1662_v40  ;;  %vm1671_vm6 = vmor %vm1669_vm5, %vm1670_vm4  ;;  %vm1679_vm9 = vweird.f32 %v1662_v40 }
 0xc52   :  { %v1665_v16 = vmul.f32 %v3185_v42, %v1664_v43 }
 0xc54   :  { %v1666_v45 = vmul.f32 0.5, %v1665_v16 }
 0xc56   :  { %v1667_v46 = vsub.f32 1.5, %v1666_v45 }
 0xc57   :  { %v3187_v49 = vpop.eup %3186 }
 0xc58   :  { %v1668_v30 = vmul.f32 %v3185_v42, %v1667_v46  ;;  %v1674_v52 = vmul.f32 %v3187_v49, %v1662_v40  ;;  %vm1680_vm8 = vweird.f32 %v3187_v49 }
 0xc59   :  { %vm1681_vm10 = vmor %vm1679_vm9, %vm1680_vm8 }
 0xc5a   :  { %v1675_v53 = vmul.f32 %v3187_v49, %v1674_v52  ;;  %v1672_v56 = vsel %vm1671_vm6, %v3185_v42, %v1668_v30 }
 0xc5b   :  { %v1683_v60 = vmul.f32 %v1672_v56, %v3820_v41 }
 0xc5c   :  { %v1676_v57 = vmul.f32 0.5, %v1675_v53 }
 0xc5d   :  { %v1688_v63 = vmul.f32 %v3091_v18, %v1683_v60 }
 0xc5e   :  { %v1677_v58 = vsub.f32 1.5, %v1676_v57 }
 0xc5f   :  { %v3839_v28 = vadd.f32 %v3092_v23, %v1688_v63 }
 0xc60   :  { %v1678_v62 = vmul.f32 %v3187_v49, %v1677_v58 }
 0xc62   :  { %v1682_v4 = vsel %vm1681_vm10, %v3187_v49, %v1678_v62 }
 0xc63   :  { %v1684_v17 = vmul.f32 %v1682_v4, %v3825_v44  ;;  %v3050_v44 = vld [vmem:[#allocation7 + $0xe0] sm:$0xff] }
 0xc64   :  { %2017 = vmatpush.bf16.msra.mxu3 %v3050_v44 }
 0xc65   :  { %v1689_v22 = vmul.f32 %v3091_v18, %v1684_v17 }
 0xc67   :  { %v3841_v0 = vadd.f32 %v3092_v23, %v1689_v22 }
 0xc68   :  { %2018 = vmatpush.bf16.msra.mxu3 %v3049_v3 }
 0xc69   :  { %v1712_v41 = vpack.c.bf16 %v3841_v0, %v3839_v28 }
 0xc6b   :  { %1808 = vmatmul.bf16.vlgmr.msra.gmra.mxu1 %v1712_v41  ;;  %1822 = vmatmul.bf16.vlgmr.msra.gmra.mxu0 %v1712_v41  ;;  %v3093_v41 = vld [vmem:[%s3939_s15 + $0x1] ss:$0 sm:$0xff] }
 0xc6c   :  { %2019 = vmatpush.bf16.msra.mxu3 %v3048_v7 }
 0xc70   :  { %2020 = vmatpush.bf16.msra.mxu3 %v3047_v10 }
 0xc74   :  { %2021 = vmatpush.bf16.msra.mxu3 %v3046_v55 }
 0xce8   :  { %v1809_v21 = vpop.f32.mrf.mxu1  ;;  %v1823_v24 = vpop.f32.mrf.mxu0 }
 0xce9   :  { %v1810_v25 = vadd.f32 %v1809_v21, %v1716_v19  ;;  %v1824_v26 = vadd.f32 %v1823_v24, %v1717_v20 }
 0xceb   :  { %v1832_v48 = vmul.f32 0.044715, %v1810_v25  ;;  %v1833_v12 = vmul.f32 0.044715, %v1824_v26  ;;  %v1828_v53 = vmul.f32 0.5, %v1810_v25  ;;  %v1829_v58 = vmul.f32 0.5, %v1824_v26 }
 0xced   :  { %v1836_v32 = vmul.f32 %v1832_v48, %v1810_v25  ;;  %v1837_v51 = vmul.f32 %v1833_v12, %v1824_v26 }
 0xcef   :  { %v1840_v33 = vmul.f32 %v1836_v32, %v1810_v25  ;;  %v1841_v14 = vmul.f32 %v1837_v51, %v1824_v26 }
 0xcf0   :  { %v1811_v34 = vpop.f32.mrf.mxu1  ;;  %v1825_v35 = vpop.f32.mrf.mxu0 }
 0xcf1   :  { %v1844_v11 = vadd.f32 %v1840_v33, %v1810_v25  ;;  %v1812_v36 = vadd.f32 %v1811_v34, %v1716_v19  ;;  %v1826_v31 = vadd.f32 %v1825_v35, %v1717_v20  ;;  %v1845_v47 = vadd.f32 %v1841_v14, %v1824_v26 }
 0xcf3   :  { %v1834_v50 = vmul.f32 0.044715, %v1812_v36  ;;  %v1835_v59 = vmul.f32 0.044715, %v1826_v31  ;;  %v1848_v15 = vmul.f32 0.7978846, %v1844_v11 }
 0xcf4   :  { %v1849_v6 = vmul.f32 0.7978846, %v1845_v47  ;;  %v1830_v56 = vmul.f32 0.5, %v1812_v36  ;;  %v1831_v60 = vmul.f32 0.5, %v1826_v31 }
 0xcf5   :  { %v1838_v37 = vmul.f32 %v1834_v50, %v1812_v36  ;;  %v1839_v38 = vmul.f32 %v1835_v59, %v1826_v31  ;;  %3188 = vtanh.f32 %v1848_v15 }
 0xcf6   :  { %3190 = vtanh.f32 %v1849_v6 }
 0xcf7   :  { %v1842_v39 = vmul.f32 %v1838_v37, %v1812_v36  ;;  %v1843_v61 = vmul.f32 %v1839_v38, %v1826_v31 }
 0xcf9   :  { %v1846_v42 = vadd.f32 %v1842_v39, %v1812_v36  ;;  %v1847_v40 = vadd.f32 %v1843_v61, %v1826_v31 }
 0xcfb   :  { %v1850_v43 = vmul.f32 0.7978846, %v1846_v42  ;;  %v1851_v29 = vmul.f32 0.7978846, %v1847_v40  ;;  %v3189_v16 = vpop.eup %3188  ;;  %v3095_v40 = vld [vmem:[%s3941_s17 + $0x1] ss:$0 sm:$0xff] }
 0xcfc   :  { %v3191_v45 = vpop.eup %3190  ;;  %v1856_v46 = vadd.f32 1.0, %v3189_v16 }
 0xcfd   :  { %3192 = vtanh.f32 %v1850_v43  ;;  %v1857_v30 = vadd.f32 1.0, %v3191_v45  ;;  %v2084_v45 = vld [vmem:[%s3964_s30] sm:$0x3] }
 0xcfe   :  { %3194 = vtanh.f32 %v1851_v29  ;;  %v1860_v62 = vmul.f32 %v1856_v46, %v1828_v53  ;;  %v3061_v46 = vld [vmem:[%s3942_s18 + $0x38] sm:$0xff] }
 0xcff   :  { %v1861_v17 = vmul.f32 %v1857_v30, %v1829_v58  ;;  %v3059_v30 = vld [vmem:[%s3942_s18 + $0x28] sm:$0xff]  ;;  %v3057_v53 = vld [vmem:[%s3942_s18 + $0x18] sm:$0xff]  ;;  %v3054_v58 = vld [vmem:[%s3942_s18] sm:$0xff] }
 0xd03   :  { %v3193_v49 = vpop.eup %3192 }
 0xd04   :  { %v3195_v52 = vpop.eup %3194  ;;  %v1858_v57 = vadd.f32 1.0, %v3193_v49  ;;  %v3060_v49 = vld [vmem:[%s3942_s18 + $0x30] sm:$0xff] }
 0xd05   :  { %v1859_v18 = vadd.f32 1.0, %v3195_v52  ;;  %v3058_v52 = vld [vmem:[%s3942_s18 + $0x20] sm:$0xff] }
 0xd06   :  { %v1862_v4 = vmul.f32 %v1858_v57, %v1830_v56  ;;  %v3056_v56 = vld [vmem:[%s3942_s18 + $0x10] sm:$0xff]  ;;  %v3055_v57 = vld [vmem:[%s3942_s18 + $0x8] sm:$0xff] }
 0xd07   :  { %v1863_v63 = vmul.f32 %v1859_v18, %v1831_v60  ;;  %v3069_v60 = vld [vmem:[%s3944_s20 + $0x38] sm:$0xff]  ;;  %v3068_v18 = vld [vmem:[%s3944_s20 + $0x30] sm:$0xff] }
 0xd08   :  { %v1897_v23 = vpack.c.bf16 %v1862_v4, %v1860_v62  ;;  %2268 = vmatpush.bf16.msrb.mxu1 %v3069_v60 }
 0xd09   :  { %v1898_v22 = vpack.c.bf16 %v1863_v63, %v1861_v17  ;;  %v3067_v17 = vld [vmem:[%s3944_s20 + $0x28] sm:$0xff]  ;;  %v3066_v63 = vld [vmem:[%s3944_s20 + $0x20] sm:$0xff] }
 0xd0a   :  { %2008 = vmatmul.bf16.vlgmr.msrb.gmra.mxu2 %v1897_v23  ;;  %v3065_v23 = vld [vmem:[%s3944_s20 + $0x18] sm:$0xff] }
 0xd0b   :  { %2022 = vmatmul.bf16.vlgmr.msra.gmra.mxu3 %v1898_v22  ;;  %v3064_v22 = vld [vmem:[%s3944_s20 + $0x10] sm:$0xff] }
 0xd0c   :  { %2269 = vmatpush.bf16.msrb.mxu1 %v3068_v18 }
 0xd10   :  { %2270 = vmatpush.bf16.msrb.mxu1 %v3067_v17 }
 0xd14   :  { %2271 = vmatpush.bf16.msrb.mxu1 %v3066_v63 }
 0xd18   :  { %2272 = vmatpush.bf16.msrb.mxu1 %v3065_v23 }
 0xd1c   :  { %2273 = vmatpush.bf16.msrb.mxu1 %v3064_v22 }
 0xd8d   :  { %v2009_v27 = vpop.f32.mrf.mxu2 }
 0xd8e   :  { %v2010_v1 = vadd.f32 %v3093_v41, %v2009_v27  ;;  %v2023_v44 = vpop.f32.mrf.mxu3  ;;  %v3062_v27 = vld [vmem:[%s3944_s20] sm:$0xff] }
 0xd90   :  { %v2024_v2 = vadd.f32 %v2023_v44, %v2010_v1  ;;  %v3096_v1 = vld [vmem:[%s3943_s19] ss:$0 sm:$0xff]  ;;  %s3332_s19 = smov [#allocation8]  }
 0xd92   :  { %v2028_v3 = vadd.f32 %v2024_v2, %v3839_v28 }
 0xd94   :  { %2034 = vadd.xlane.f32.xlu1 %v2028_v3 }
 0xd95   :  { %v2011_v5 = vpop.f32.mrf.mxu2 }
 0xd96   :  { %v2012_v7 = vadd.f32 %v3093_v41, %v2011_v5  ;;  %v2025_v9 = vpop.f32.mrf.mxu3  ;;  %v3063_v41 = vld [vmem:[%s3944_s20 + $0x8] sm:$0xff] }
 0xd97   :  { %2274 = vmatpush.bf16.msrb.mxu1 %v3063_v41 }
 0xd98   :  { %v2026_v10 = vadd.f32 %v2025_v9, %v2012_v7 }
 0xd9a   :  { %v2029_v54 = vadd.f32 %v2026_v10, %v3841_v0 }
 0xd9b   :  { %2275 = vmatpush.bf16.msrb.mxu1 %v3062_v27 }
 0xd9c   :  { %2036 = vadd.xlane.f32.xlu0 %v2029_v54 }
 0xe07   :  { %v2035_v13 = vpop.xlane.xlu1 %2034 }
 0xe08   :  { %v2038_v55 = vmul.f32 %v2035_v13, %v3463_v8 }
 0xe0a   :  { %v2040_v19 = vsub.f32 %v2028_v3, %v2038_v55 }
 0xe0c   :  { %v2042_v20 = vmul.f32 %v2040_v19, %v2040_v19 }
 0xe0e   :  { %2044 = vadd.xlane.f32.xlu0 %v2042_v20 }
 0xe0f   :  { %v2037_v21 = vpop.xlane.xlu0 %2036 }
 0xe10   :  { %v2039_v24 = vmul.f32 %v2037_v21, %v3463_v8 }
 0xe12   :  { %v2041_v25 = vsub.f32 %v2029_v54, %v2039_v24  ;;  %v3097_v24 = vld [vmem:[%s3945_s21] ss:$0 sm:$0xff]  ;;  %s2304_s21 = sshll.u32 %s3332_s19, 4  ;;  %s2305_s21 = int_to_ptr.vmem [resolvable:$true] %s2304_s21 }
 0xe14   :  { %v2043_v26 = vmul.f32 %v2041_v25, %v2041_v25 }
 0xe16   :  { %2046 = vadd.xlane.f32.xlu2 %v2043_v26 }
 0xe81   :  { %v2045_v28 = vpop.xlane.xlu0 %2044 }
 0xe82   :  { %v2048_v48 = vmul.f32 %v2045_v28, %v3463_v8 }
 0xe84   :  { %v2050_v12 = vadd.f32 1e-12, %v2048_v48 }
 0xe86   :  { %3196 = vrsqrt.f32 %v2050_v12  ;;  %vm2058_vm12 = vweird.f32 %v2050_v12 }
 0xe89   :  { %v2047_v32 = vpop.xlane.xlu2 %2046 }
 0xe8a   :  { %v2049_v0 = vmul.f32 %v2047_v32, %v3463_v8  ;;  %v3094_v8 = vld [vmem:[%s3940_s16 + $0x1] ss:$0 sm:$0xff] }
 0xe8c   :  { %v3197_v51 = vpop.eup %3196  ;;  %v2051_v33 = vadd.f32 1e-12, %v2049_v0 }
 0xe8d   :  { %v2053_v14 = vmul.f32 %v3197_v51, %v2050_v12  ;;  %vm2059_vm11 = vweird.f32 %v3197_v51 }
 0xe8e   :  { %3198 = vrsqrt.f32 %v2051_v33  ;;  %vm2060_vm13 = vmor %vm2058_vm12, %vm2059_vm11  ;;  %vm2068_vm15 = vweird.f32 %v2051_v33 }
 0xe8f   :  { %v2054_v34 = vmul.f32 %v3197_v51, %v2053_v14 }
 0xe91   :  { %v2055_v35 = vmul.f32 0.5, %v2054_v34 }
 0xe93   :  { %v2056_v11 = vsub.f32 1.5, %v2055_v35 }
 0xe94   :  { %v3199_v36 = vpop.eup %3198 }
 0xe95   :  { %v2063_v31 = vmul.f32 %v3199_v36, %v2051_v33  ;;  %v2057_v47 = vmul.f32 %v3197_v51, %v2056_v11  ;;  %vm2069_vm14 = vweird.f32 %v3199_v36 }
 0xe96   :  { %vm2070_vm0 = vmor %vm2068_vm15, %vm2069_vm14 }
 0xe97   :  { %v2064_v50 = vmul.f32 %v3199_v36, %v2063_v31  ;;  %v2061_v15 = vsel %vm2060_vm13, %v3197_v51, %v2057_v47 }
 0xe98   :  { %v2072_v38 = vmul.f32 %v2061_v15, %v2040_v19 }
 0xe99   :  { %v2065_v59 = vmul.f32 0.5, %v2064_v50 }
 0xe9a   :  { %v2077_v43 = vmul.f32 %v3094_v8, %v2072_v38 }
 0xe9b   :  { %v2066_v37 = vsub.f32 1.5, %v2065_v59 }
 0xe9c   :  { %v2082_v16 = vadd.f32 %v3095_v40, %v2077_v43 }
 0xe9d   :  { %v2067_v6 = vmul.f32 %v3199_v36, %v2066_v37 }
 0xe9f   :  { %v2071_v39 = vsel %vm2070_vm0, %v3199_v36, %v2067_v6 }
 0xea0   :  { %v2073_v61 = vmul.f32 %v2071_v39, %v2041_v25 }
 0xea2   :  { %v2078_v42 = vmul.f32 %v3094_v8, %v2073_v61 }
 0xea4   :  { %v2083_v29 = vadd.f32 %v3095_v40, %v2078_v42 }
 0xea6   :  { %2102 = vmatpush.msrb.mxu0 %v2083_v29 }
 0xea8   :  { %2103 = vmatpush.msrb.mxu0 %v2082_v16 }
 0xea9   :  { %2861 = vmatmul.msk.f32.vlgmr.msrb.gmra.mxu0 %vm467_vm7, %v2084_v45  ;;  %vm2282_vm7 = vcmask 1041408  }
 0xeaa   :  { %2177 = vmatpush.bf16.msra.mxu0 %v3061_v46 }
 0xeae   :  { %2178 = vmatpush.bf16.msra.mxu0 %v3060_v49 }
 0xeb2   :  { %2179 = vmatpush.bf16.msra.mxu0 %v3059_v30 }
 0xeb6   :  { %2180 = vmatpush.bf16.msra.mxu0 %v3058_v52 }
 0xeba   :  { %2181 = vmatpush.bf16.msra.mxu0 %v3057_v53 }
 0xebe   :  { %2182 = vmatpush.bf16.msra.mxu0 %v3056_v56 }
 0xec2   :  { %2183 = vmatpush.bf16.msra.mxu0 %v3055_v57 }
 0xec6   :  { %2184 = vmatpush.bf16.msra.mxu0 %v3054_v58 }
 0xf26   :  { %v2105_v62 = vpop.f32.mrf.mxu0 }
 0xf27   :  { %v2124_v4 = vpack.c.bf16 %v2105_v62, %v2105_v62 }
 0xf29   :  { %2185 = vmatmul.bf16.vlgmr.msra.gmra.mxu0 %v2124_v4 }
 0xfa6   :  { %v2186_v44 = vpop.f32.mrf.mxu0 }
 0xfa7   :  { %v2187_v2 = vadd.f32 %v3096_v1, %v2186_v44 }
 0xfa9   :  { %v2191_v3 = vmul.f32 0.044715, %v2187_v2  ;;  %v2190_v55 = vmul.f32 0.5, %v2187_v2 }
 0xfab   :  { %v2192_v5 = vmul.f32 %v2191_v3, %v2187_v2 }
 0xfad   :  { %v2193_v7 = vmul.f32 %v2192_v5, %v2187_v2 }
 0xfae   :  { %v2188_v9 = vpop.f32.mrf.mxu0 }
 0xfaf   :  { %v2194_v10 = vadd.f32 %v2193_v7, %v2187_v2 }
 0xfb1   :  { %v2195_v54 = vmul.f32 0.7978846, %v2194_v10 }
 0xfb3   :  { %3200 = vtanh.f32 %v2195_v54 }
 0xfb9   :  { %v3201_v13 = vpop.eup %3200 }
 0xfba   :  { %v2197_v19 = vadd.f32 1.0, %v3201_v13 }
 0xfbc   :  { %v2198_v20 = vmul.f32 %v2197_v19, %v2190_v55 }
 0xfbe   :  { %v2215_v21 = vpack.c.bf16 %v2198_v20, %v2198_v20 }
 0xfc0   :  { %2276 = vmatmul.bf16.vlgmr.msrb.gmra.mxu1 %v2215_v21 }
0x103d   :  { %v2277_v25 = vpop.f32.mrf.mxu1 }
0x103e   :  { %v2278_v26 = vadd.f32 %v3097_v24, %v2277_v25 }
0x1040   :  { %v2281_v28 = vmul.f32 %v2278_v26, %v2278_v26 }
0x1042   :  { %v2283_v48 = vsel %vm2282_vm7, %v2281_v28, 0.0 }
0x1043   :  { %2284 = vadd.xlane.f32.xlu1 %v2283_v48 }
0x1045   :  { %v2279_v12 = vpop.f32.mrf.mxu1 }
0x10b6   :  { %v2285_v32 = vpop.xlane.xlu1 %2284 }
0x10b7   :  { %v2286_v0 = vmax.f32 %v2285_v32, 1e-24 }
0x10b9   :  { %3202 = vrsqrt.f32 %v2286_v0  ;;  %vm2293_vm2 = vweird.f32 %v2286_v0 }
0x10bf   :  { %v3203_v51 = vpop.eup %3202 }
0x10c0   :  { %v2288_v33 = vmul.f32 %v3203_v51, %v2286_v0  ;;  %vm2294_vm1 = vweird.f32 %v3203_v51 }
0x10c1   :  { %vm2295_vm3 = vmor %vm2293_vm2, %vm2294_vm1 }
0x10c2   :  { %v2289_v14 = vmul.f32 %v3203_v51, %v2288_v33 }
0x10c4   :  { %v2290_v34 = vmul.f32 0.5, %v2289_v14 }
0x10c6   :  { %v2291_v35 = vsub.f32 1.5, %v2290_v34 }
0x10c8   :  { %v2292_v11 = vmul.f32 %v3203_v51, %v2291_v35 }
0x10ca   :  { %v2296_v36 = vsel %vm2295_vm3, %v3203_v51, %v2292_v11 }
0x10cb   :  { %v2297_v31 = vmul.f32 %v2296_v36, %v2278_v26 }
0x10cd   :  { %2298 = vst [vmem:[#allocation8] sm:$0x3] %v2297_v31 }
0x10ce   :  { %2309 = dma.vmem_to_hbm [thread:$0]  %s2305_s21, 32, %s2307_s8, [#allocation4]  }
0x10cf   :  { %3320 = dma.done.wait [#allocation4], 32  }
0x10d0   :  { %3321 = vsyncadd [#allocation4], 4294967264 }
0x10d1   :  { %2314 = vsyncpa [#allocation3], 1 }
0x10d2   :  { %2315 = vsyncpa [#allocation6], 1 }
0x10d3   :  { %2316 = vsyncpa [#allocation4], 1 }

</bundles_post_ra>
